<compile_context>
chip_gen: v7x
topology: tpu7x:2x2x1
jax: 0.10.0
libtpu: 0.0.40
codegen_flags: <defaults>
</compile_context>

<pallas_src>
import functools

import jax
import jax.numpy as jnp
from jax.experimental import pallas as pl
from jax.experimental.pallas import tpu as pltpu

# Hyper-params (emb/hidden/num_steps match the PyTorch module constants;
# vocab kept small & synthetic).
EMB_SIZE = 128
HIDDEN_SIZE = 256
NUM_STEPS = 3
VOCAB_SIZE = 512
OUTPUT_SIZE = VOCAB_SIZE


def wordrnn_kernel(emb_ref, w_in_ref, b_in_ref, w_step_ref, b1_ref,
                   w2_ref, b2_ref, wub_ref, bu_ref, wo_ref, bo_ref,
                   out_ref, *, seq, hidden, num_steps):
    S, H = seq, hidden

    # (S, 1) sequence-position masks: row t has a "prev" neighbour iff t >= 1
    # and a "next" neighbour iff t <= S-2.  Kept tiny (sublane broadcast in the
    # multiply) instead of materialising (S, H) masks.
    pos = jax.lax.broadcasted_iota(jnp.int32, (S, 1), 0)
    fwd_mask = (pos >= 1).astype(jnp.float32)
    bwd_mask = (pos <= S - 2).astype(jnp.float32)

    # (1, H)/(1, V) biases added directly; the VPU broadcasts across sublanes.
    b_in, b1, b2, bu, bo = (b_in_ref[...], b1_ref[...], b2_ref[...],
                            bu_ref[...], bo_ref[...])

    # h0 = relu(input_fc(emb)).  The torch code recomputes it every step, but
    # it is loop-invariant — as is h0 @ wu[H:] (update_fc half acting on h0).
    emb = emb_ref[...].astype(jnp.bfloat16)                            # (S, E)
    h0 = jnp.maximum(
        jnp.dot(emb, w_in_ref[...], preferred_element_type=jnp.float32) + b_in,
        0.0)                                                           # (S, H)
    h0_wub = jnp.dot(h0.astype(jnp.bfloat16), wub_ref[...],
                     preferred_element_type=jnp.float32)               # (S, H)
    h = h0

    # Message-passing steps (static Python unroll, num_steps is small).
    for _ in range(num_steps):
        hb = h.astype(jnp.bfloat16)
        # One fused (S, H) @ (H, 3H) dot covering msg_fc1 (both halves) plus
        # the update_fc half acting on h; slices fall on 256-lane boundaries.
        hw = jnp.dot(hb, w_step_ref[...], preferred_element_type=jnp.float32)
        hw_a, hw_b, hw_u = hw[:, :H], hw[:, H:2 * H], hw[:, 2 * H:]
        # +/-1 sequence shifts as XLU sublane rolls (no MXU, no (S,S) matrices);
        # wrapped boundary rows are removed by fwd_mask / bwd_mask below.
        hw_b_prev = pltpu.roll(hw_b, shift=1, axis=0)        # row t <- row t-1
        hw_b_next = pltpu.roll(hw_b, shift=S - 1, axis=0)    # row t <- row t+1
        #   msg_fc1(concat([h_i, h_j])) = h_i @ w1[:H] + h_j @ w1[H:] + b1
        m1_fwd = jnp.maximum(hw_a + hw_b_prev + b1, 0.0)     # valid for t >= 1
        m1_bwd = jnp.maximum(hw_a + hw_b_next + b1, 0.0)     # valid for t <= S-2
        # Stack directions along sublanes (tile-boundary concat, no relayout)
        # so msg_fc2 is a single (2S, H) @ (H, H) dot.
        m1 = jnp.concatenate([m1_fwd, m1_bwd], axis=0).astype(jnp.bfloat16)
        m2 = jnp.maximum(
            jnp.dot(m1, w2_ref[...], preferred_element_type=jnp.float32) + b2,
            0.0)
        m = fwd_mask * m2[:S, :] + bwd_mask * m2[S:, :]
        # update_fc(concat([h, h0], -1)) == h @ wu[:H] + h0 @ wu[H:] + bu
        h = jnp.maximum(hw_u + h0_wub + bu + m, 0.0)

    # Mean-pool over the sequence: S-row sublane reduction (no f32 pool matmul).
    h_pool = jnp.mean(h, axis=0, keepdims=True)                        # (1, H)
    logits = jnp.dot(h_pool.astype(jnp.bfloat16), wo_ref[...],
                     preferred_element_type=jnp.float32) + bo          # (1, V)
    mx = jnp.max(logits, axis=-1, keepdims=True)
    shifted = logits - mx
    lse = jnp.log(jnp.sum(jnp.exp(shifted), axis=-1, keepdims=True))
    # Lane-dense full-tile store; the wrapper reads row 0 of each block.
    out_ref[...] = jnp.broadcast_to(shifted - lse, (S, shifted.shape[-1]))


def word_rnn_forward(kparams, input_words):
    # Embedding gather (glue) stays in plain JAX; everything else in the kernel.
    B, S = input_words.shape
    H, E, V = HIDDEN_SIZE, EMB_SIZE, OUTPUT_SIZE
    emb = jnp.take(kparams["embedding"], input_words.reshape(-1), axis=0)  # (B*S, E)

    kernel = functools.partial(wordrnn_kernel, seq=S, hidden=H,
                               num_steps=NUM_STEPS)

    def const(shape):
        # Whole array, same block for every grid step -> stays VMEM-resident.
        return pl.BlockSpec(shape, lambda b: (0, 0))

    out = pl.pallas_call(
        kernel,
        out_shape=jax.ShapeDtypeStruct((B * S, V), jnp.float32),
        grid=(B,),
        in_specs=[
            pl.BlockSpec((S, E), lambda b: (b, 0)),      # emb, one sequence/step
            const((E, H)), const((1, H)),                # w_in, b_in
            const((H, 3 * H)), const((1, H)),            # w_step, b1
            const((H, H)), const((1, H)),                # w2, b2
            const((H, H)), const((1, H)),                # wub, bu
            const((H, V)), const((1, V)),                # wo, bo
        ],
        out_specs=pl.BlockSpec((S, V), lambda b: (b, 0)),
        compiler_params=pltpu.CompilerParams(
            dimension_semantics=("parallel",),           # 2 TCs on v7x
            vmem_limit_bytes=32 * 1024 * 1024),
    )(emb,
      kparams["w_in"], kparams["b_in"],
      kparams["w_step"], kparams["b1"],
      kparams["w2"], kparams["b2"],
      kparams["wub"], kparams["bu"],
      kparams["wo"], kparams["bo"])
    # Each (S, V) block holds the batch row's log-probs broadcast over S rows.
    return out.reshape(B, S, V)[:, 0, :]


def init_params(key):
    ks = jax.random.split(key, 12)

    def linear(kw, kb, fan_in, fan_out):
        bound = 1.0 / float(fan_in) ** 0.5      # torch nn.Linear default init
        w = jax.random.uniform(kw, (fan_in, fan_out), jnp.float32, -bound, bound)
        b = jax.random.uniform(kb, (1, fan_out), jnp.float32, -bound, bound)
        return w, b

    emb = jax.random.normal(ks[0], (VOCAB_SIZE, EMB_SIZE), jnp.float32)
    emb = emb.at[0].set(0.0)                    # padding_idx = 0
    w_in, b_in = linear(ks[1], ks[2], EMB_SIZE, HIDDEN_SIZE)
    w1, b1 = linear(ks[3], ks[4], 2 * HIDDEN_SIZE, HIDDEN_SIZE)
    w2, b2 = linear(ks[5], ks[6], HIDDEN_SIZE, HIDDEN_SIZE)
    wu, bu = linear(ks[7], ks[8], 2 * HIDDEN_SIZE, HIDDEN_SIZE)
    wo, bo = linear(ks[9], ks[10], HIDDEN_SIZE, OUTPUT_SIZE)
    return dict(embedding=emb, w_in=w_in, b_in=b_in, w1=w1, b1=b1,
                w2=w2, b2=b2, wu=wu, bu=bu, wo=wo, bo=bo)


def prepare_kernel_params(params):
    """Split concat-facing weights, fuse the per-step dots, cast weights to bf16."""
    H = HIDDEN_SIZE
    bf = jnp.bfloat16
    w1a, w1b = params["w1"][:H], params["w1"][H:]
    wua, wub = params["wu"][:H], params["wu"][H:]
    # One fused per-step weight: [msg_fc1_a | msg_fc1_b | update_fc_a], (H, 3H).
    w_step = jnp.concatenate([w1a, w1b, wua], axis=1).astype(bf)
    return dict(
        embedding=params["embedding"],
        w_in=params["w_in"].astype(bf), b_in=params["b_in"],
        w_step=w_step, b1=params["b1"],
        w2=params["w2"].astype(bf), b2=params["b2"],
        wub=wub.astype(bf), bu=params["bu"],
        wo=params["wo"].astype(bf), bo=params["bo"],
    )


def _reference(params, input_words, matmul):
    # Pure-JAX reference mirroring the (intended) PyTorch semantics.
    emb = jnp.take(params["embedding"], input_words, axis=0)

    def lin(x, w, b):
        return matmul(x, w) + b

    h0 = jax.nn.relu(lin(emb, params["w_in"], params["b_in"]))
    h = h0
    for _ in range(NUM_STEPS):
        def msg(hi, hj):
            x = jnp.concatenate([hi, hj], axis=-1)
            m = jax.nn.relu(lin(x, params["w1"], params["b1"]))
            return jax.nn.relu(lin(m, params["w2"], params["b2"]))
        m = jnp.zeros_like(h)
        m = m.at[:, 1:].add(msg(h[:, 1:], h[:, :-1]))
        m = m.at[:, :-1].add(msg(h[:, :-1], h[:, 1:]))
        h = jax.nn.relu(lin(jnp.concatenate([h, h0], axis=-1),
                            params["wu"], params["bu"]) + m)
    h_pool = jnp.mean(h, axis=1)
    logits = matmul(h_pool, params["wo"]) + params["bo"]
    return jax.nn.log_softmax(logits, axis=1)


def reference_forward_f32(params, input_words):
    return _reference(params, input_words,
                      lambda x, w: jnp.matmul(x, w,
                                              preferred_element_type=jnp.float32))


def reference_forward_bf16(params, input_words):
    # Matches the kernel's precision: bf16 matmul inputs, f32 accumulation.
    def mm(x, w):
        return jnp.matmul(x.astype(jnp.bfloat16), w.astype(jnp.bfloat16),
                          preferred_element_type=jnp.float32)
    return _reference(params, input_words, mm)


if __name__ == "__main__":
    key = jax.random.PRNGKey(0)
    kp, kx = jax.random.split(key)
    params = init_params(kp)
    kparams = prepare_kernel_params(params)

    B, S = 2, 8
    input_words = jax.random.randint(kx, (B, S), 0, VOCAB_SIZE, dtype=jnp.int32)

    out = jax.block_until_ready(word_rnn_forward(kparams, input_words))
    assert out.shape == (B, OUTPUT_SIZE)

    # Tight check against a reference with matching bf16-matmul precision.
    ref_bf16 = reference_forward_bf16(params, input_words)
    err_bf16 = float(jnp.max(jnp.abs(out - ref_bf16)))
    assert jnp.allclose(out, ref_bf16, atol=3e-3, rtol=1e-3), \
        f"bf16-matched reference max_err={err_bf16}"

    # Loose sanity check against the full-f32 reference (bounds bf16 quant error).
    ref_f32 = reference_forward_f32(params, input_words)
    err_f32 = float(jnp.max(jnp.abs(out - ref_f32)))
    assert err_f32 < 0.2, f"f32 reference max_err={err_f32}"

    print("KERNEL_OK")
</pallas_src>

<mosaic_0001>
module attributes {stable_mosaic.version = 11 : i64} {
  func.func @wordrnn_kernel(%arg0: i32, %arg1: memref<8x128xf32, #tpu.memory_space<vmem>>, %arg2: memref<128x256xbf16, #tpu.memory_space<vmem>>, %arg3: memref<1x256xf32, #tpu.memory_space<vmem>>, %arg4: memref<256x768xbf16, #tpu.memory_space<vmem>>, %arg5: memref<1x256xf32, #tpu.memory_space<vmem>>, %arg6: memref<256x256xbf16, #tpu.memory_space<vmem>>, %arg7: memref<1x256xf32, #tpu.memory_space<vmem>>, %arg8: memref<256x256xbf16, #tpu.memory_space<vmem>>, %arg9: memref<1x256xf32, #tpu.memory_space<vmem>>, %arg10: memref<256x512xbf16, #tpu.memory_space<vmem>>, %arg11: memref<1x512xf32, #tpu.memory_space<vmem>>, %arg12: memref<8x512xf32, #tpu.memory_space<vmem>>) attributes {dimension_semantics = [#tpu.dimension_semantics<parallel>], iteration_bounds = array<i64: 2>, scalar_prefetch = 0 : i64, scratch_operands = 0 : i64, tpu.core_type = #tpu.core_type<tc>, window_params = [{transform_indices = @transform_0, window_bounds = array<i64: 8, 128>}, {pipeline_mode = #tpu.pipeline_mode<synchronous>, transform_indices = @transform_1, window_bounds = array<i64: 128, 256>}, {pipeline_mode = #tpu.pipeline_mode<synchronous>, transform_indices = @transform_2, window_bounds = array<i64: 1, 256>}, {pipeline_mode = #tpu.pipeline_mode<synchronous>, transform_indices = @transform_3, window_bounds = array<i64: 256, 768>}, {pipeline_mode = #tpu.pipeline_mode<synchronous>, transform_indices = @transform_4, window_bounds = array<i64: 1, 256>}, {pipeline_mode = #tpu.pipeline_mode<synchronous>, transform_indices = @transform_5, window_bounds = array<i64: 256, 256>}, {pipeline_mode = #tpu.pipeline_mode<synchronous>, transform_indices = @transform_6, window_bounds = array<i64: 1, 256>}, {pipeline_mode = #tpu.pipeline_mode<synchronous>, transform_indices = @transform_7, window_bounds = array<i64: 256, 256>}, {pipeline_mode = #tpu.pipeline_mode<synchronous>, transform_indices = @transform_8, window_bounds = array<i64: 1, 256>}, {pipeline_mode = #tpu.pipeline_mode<synchronous>, transform_indices = @transform_9, window_bounds = array<i64: 256, 512>}, {pipeline_mode = #tpu.pipeline_mode<synchronous>, transform_indices = @transform_10, window_bounds = array<i64: 1, 512>}, {transform_indices = @transform_11, window_bounds = array<i64: 8, 512>}]} {
    %0 = tpu.iota {dimensions = array<i32: 0>} : vector<8x1xi32>
    %c1_i32 = arith.constant 1 : i32
    %1 = vector.broadcast %c1_i32 : i32 to vector<8x1xi32>
    %2 = arith.cmpi sge, %0, %1 : vector<8x1xi32>
    %3 = arith.extui %2 : vector<8x1xi1> to vector<8x1xi32>
    %4 = arith.sitofp %3 : vector<8x1xi32> to vector<8x1xf32>
    %c6_i32 = arith.constant 6 : i32
    %5 = vector.broadcast %c6_i32 : i32 to vector<8x1xi32>
    %6 = arith.cmpi sle, %0, %5 : vector<8x1xi32>
    %7 = arith.extui %6 : vector<8x1xi1> to vector<8x1xi32>
    %8 = arith.sitofp %7 : vector<8x1xi32> to vector<8x1xf32>
    %c0 = arith.constant 0 : index
    %c0_0 = arith.constant 0 : index
    %9 = vector.load %arg3[%c0, %c0_0] : memref<1x256xf32, #tpu.memory_space<vmem>>, vector<1x256xf32>
    %c0_1 = arith.constant 0 : index
    %c0_2 = arith.constant 0 : index
    %10 = vector.load %arg5[%c0_1, %c0_2] : memref<1x256xf32, #tpu.memory_space<vmem>>, vector<1x256xf32>
    %c0_3 = arith.constant 0 : index
    %c0_4 = arith.constant 0 : index
    %11 = vector.load %arg7[%c0_3, %c0_4] : memref<1x256xf32, #tpu.memory_space<vmem>>, vector<1x256xf32>
    %c0_5 = arith.constant 0 : index
    %c0_6 = arith.constant 0 : index
    %12 = vector.load %arg9[%c0_5, %c0_6] : memref<1x256xf32, #tpu.memory_space<vmem>>, vector<1x256xf32>
    %c0_7 = arith.constant 0 : index
    %c0_8 = arith.constant 0 : index
    %13 = vector.load %arg11[%c0_7, %c0_8] : memref<1x512xf32, #tpu.memory_space<vmem>>, vector<1x512xf32>
    %c0_9 = arith.constant 0 : index
    %c0_10 = arith.constant 0 : index
    %14 = vector.load %arg1[%c0_9, %c0_10] : memref<8x128xf32, #tpu.memory_space<vmem>>, vector<8x128xf32>
    %15 = arith.truncf %14 : vector<8x128xf32> to vector<8x128xbf16>
    %c0_11 = arith.constant 0 : index
    %c0_12 = arith.constant 0 : index
    %16 = vector.load %arg2[%c0_11, %c0_12] : memref<128x256xbf16, #tpu.memory_space<vmem>>, vector<128x256xbf16>
    %cst = arith.constant dense<0.000000e+00> : vector<8x256xf32>
    %17 = tpu.matmul %15, %16, %cst {dimension_numbers = #tpu.dot_dimension_numbers<[1], [0], [0], [1], [0, 0, 1, 1], [], []>} : vector<8x128xbf16>, vector<128x256xbf16>, vector<8x256xf32> -> vector<8x256xf32>
    %18 = vector.broadcast %9 : vector<1x256xf32> to vector<8x256xf32>
    %19 = arith.addf %17, %18 : vector<8x256xf32>
    %cst_13 = arith.constant 0.000000e+00 : f32
    %20 = vector.broadcast %cst_13 : f32 to vector<8x256xf32>
    %21 = arith.maximumf %19, %20 : vector<8x256xf32>
    %22 = arith.truncf %21 : vector<8x256xf32> to vector<8x256xbf16>
    %c0_14 = arith.constant 0 : index
    %c0_15 = arith.constant 0 : index
    %23 = vector.load %arg8[%c0_14, %c0_15] : memref<256x256xbf16, #tpu.memory_space<vmem>>, vector<256x256xbf16>
    %cst_16 = arith.constant dense<0.000000e+00> : vector<8x256xf32>
    %24 = tpu.matmul %22, %23, %cst_16 {dimension_numbers = #tpu.dot_dimension_numbers<[1], [0], [0], [1], [0, 0, 1, 1], [], []>} : vector<8x256xbf16>, vector<256x256xbf16>, vector<8x256xf32> -> vector<8x256xf32>
    %25 = arith.truncf %21 : vector<8x256xf32> to vector<8x256xbf16>
    %c0_17 = arith.constant 0 : index
    %c0_18 = arith.constant 0 : index
    %26 = vector.load %arg4[%c0_17, %c0_18] : memref<256x768xbf16, #tpu.memory_space<vmem>>, vector<256x768xbf16>
    %cst_19 = arith.constant dense<0.000000e+00> : vector<8x768xf32>
    %27 = tpu.matmul %25, %26, %cst_19 {dimension_numbers = #tpu.dot_dimension_numbers<[1], [0], [0], [1], [0, 0, 1, 1], [], []>} : vector<8x256xbf16>, vector<256x768xbf16>, vector<8x768xf32> -> vector<8x768xf32>
    %28 = vector.extract_strided_slice %27 {offsets = [0, 0], sizes = [8, 256], strides = [1, 1]} : vector<8x768xf32> to vector<8x256xf32>
    %29 = vector.extract_strided_slice %27 {offsets = [0, 256], sizes = [8, 256], strides = [1, 1]} : vector<8x768xf32> to vector<8x256xf32>
    %30 = vector.extract_strided_slice %27 {offsets = [0, 512], sizes = [8, 256], strides = [1, 1]} : vector<8x768xf32> to vector<8x256xf32>
    %c1_i32_20 = arith.constant 1 : i32
    %31 = tpu.dynamic_rotate %29 by %c1_i32_20 dim 0 : vector<8x256xf32>, i32 -> vector<8x256xf32>
    %c7_i32 = arith.constant 7 : i32
    %32 = tpu.dynamic_rotate %29 by %c7_i32 dim 0 : vector<8x256xf32>, i32 -> vector<8x256xf32>
    %33 = arith.addf %28, %31 : vector<8x256xf32>
    %34 = vector.broadcast %10 : vector<1x256xf32> to vector<8x256xf32>
    %35 = arith.addf %33, %34 : vector<8x256xf32>
    %cst_21 = arith.constant 0.000000e+00 : f32
    %36 = vector.broadcast %cst_21 : f32 to vector<8x256xf32>
    %37 = arith.maximumf %35, %36 : vector<8x256xf32>
    %38 = arith.addf %28, %32 : vector<8x256xf32>
    %39 = vector.broadcast %10 : vector<1x256xf32> to vector<8x256xf32>
    %40 = arith.addf %38, %39 : vector<8x256xf32>
    %cst_22 = arith.constant 0.000000e+00 : f32
    %41 = vector.broadcast %cst_22 : f32 to vector<8x256xf32>
    %42 = arith.maximumf %40, %41 : vector<8x256xf32>
    %43 = tpu.concatenate %37, %42 in 0 : vector<8x256xf32>, vector<8x256xf32> -> vector<16x256xf32>
    %44 = arith.truncf %43 : vector<16x256xf32> to vector<16x256xbf16>
    %c0_23 = arith.constant 0 : index
    %c0_24 = arith.constant 0 : index
    %45 = vector.load %arg6[%c0_23, %c0_24] : memref<256x256xbf16, #tpu.memory_space<vmem>>, vector<256x256xbf16>
    %cst_25 = arith.constant dense<0.000000e+00> : vector<16x256xf32>
    %46 = tpu.matmul %44, %45, %cst_25 {dimension_numbers = #tpu.dot_dimension_numbers<[1], [0], [0], [1], [0, 0, 1, 1], [], []>} : vector<16x256xbf16>, vector<256x256xbf16>, vector<16x256xf32> -> vector<16x256xf32>
    %47 = vector.broadcast %11 : vector<1x256xf32> to vector<16x256xf32>
    %48 = arith.addf %46, %47 : vector<16x256xf32>
    %cst_26 = arith.constant 0.000000e+00 : f32
    %49 = vector.broadcast %cst_26 : f32 to vector<16x256xf32>
    %50 = arith.maximumf %48, %49 : vector<16x256xf32>
    %51 = vector.extract_strided_slice %50 {offsets = [0, 0], sizes = [8, 256], strides = [1, 1]} : vector<16x256xf32> to vector<8x256xf32>
    %52 = vector.broadcast %4 : vector<8x1xf32> to vector<8x256xf32>
    %53 = arith.mulf %52, %51 : vector<8x256xf32>
    %54 = vector.extract_strided_slice %50 {offsets = [8, 0], sizes = [8, 256], strides = [1, 1]} : vector<16x256xf32> to vector<8x256xf32>
    %55 = vector.broadcast %8 : vector<8x1xf32> to vector<8x256xf32>
    %56 = arith.mulf %55, %54 : vector<8x256xf32>
    %57 = arith.addf %53, %56 : vector<8x256xf32>
    %58 = arith.addf %30, %24 : vector<8x256xf32>
    %59 = vector.broadcast %12 : vector<1x256xf32> to vector<8x256xf32>
    %60 = arith.addf %58, %59 : vector<8x256xf32>
    %61 = arith.addf %60, %57 : vector<8x256xf32>
    %cst_27 = arith.constant 0.000000e+00 : f32
    %62 = vector.broadcast %cst_27 : f32 to vector<8x256xf32>
    %63 = arith.maximumf %61, %62 : vector<8x256xf32>
    %64 = arith.truncf %63 : vector<8x256xf32> to vector<8x256xbf16>
    %c0_28 = arith.constant 0 : index
    %c0_29 = arith.constant 0 : index
    %65 = vector.load %arg4[%c0_28, %c0_29] : memref<256x768xbf16, #tpu.memory_space<vmem>>, vector<256x768xbf16>
    %cst_30 = arith.constant dense<0.000000e+00> : vector<8x768xf32>
    %66 = tpu.matmul %64, %65, %cst_30 {dimension_numbers = #tpu.dot_dimension_numbers<[1], [0], [0], [1], [0, 0, 1, 1], [], []>} : vector<8x256xbf16>, vector<256x768xbf16>, vector<8x768xf32> -> vector<8x768xf32>
    %67 = vector.extract_strided_slice %66 {offsets = [0, 0], sizes = [8, 256], strides = [1, 1]} : vector<8x768xf32> to vector<8x256xf32>
    %68 = vector.extract_strided_slice %66 {offsets = [0, 256], sizes = [8, 256], strides = [1, 1]} : vector<8x768xf32> to vector<8x256xf32>
    %69 = vector.extract_strided_slice %66 {offsets = [0, 512], sizes = [8, 256], strides = [1, 1]} : vector<8x768xf32> to vector<8x256xf32>
    %c1_i32_31 = arith.constant 1 : i32
    %70 = tpu.dynamic_rotate %68 by %c1_i32_31 dim 0 : vector<8x256xf32>, i32 -> vector<8x256xf32>
    %c7_i32_32 = arith.constant 7 : i32
    %71 = tpu.dynamic_rotate %68 by %c7_i32_32 dim 0 : vector<8x256xf32>, i32 -> vector<8x256xf32>
    %72 = arith.addf %67, %70 : vector<8x256xf32>
    %73 = vector.broadcast %10 : vector<1x256xf32> to vector<8x256xf32>
    %74 = arith.addf %72, %73 : vector<8x256xf32>
    %cst_33 = arith.constant 0.000000e+00 : f32
    %75 = vector.broadcast %cst_33 : f32 to vector<8x256xf32>
    %76 = arith.maximumf %74, %75 : vector<8x256xf32>
    %77 = arith.addf %67, %71 : vector<8x256xf32>
    %78 = vector.broadcast %10 : vector<1x256xf32> to vector<8x256xf32>
    %79 = arith.addf %77, %78 : vector<8x256xf32>
    %cst_34 = arith.constant 0.000000e+00 : f32
    %80 = vector.broadcast %cst_34 : f32 to vector<8x256xf32>
    %81 = arith.maximumf %79, %80 : vector<8x256xf32>
    %82 = tpu.concatenate %76, %81 in 0 : vector<8x256xf32>, vector<8x256xf32> -> vector<16x256xf32>
    %83 = arith.truncf %82 : vector<16x256xf32> to vector<16x256xbf16>
    %c0_35 = arith.constant 0 : index
    %c0_36 = arith.constant 0 : index
    %84 = vector.load %arg6[%c0_35, %c0_36] : memref<256x256xbf16, #tpu.memory_space<vmem>>, vector<256x256xbf16>
    %cst_37 = arith.constant dense<0.000000e+00> : vector<16x256xf32>
    %85 = tpu.matmul %83, %84, %cst_37 {dimension_numbers = #tpu.dot_dimension_numbers<[1], [0], [0], [1], [0, 0, 1, 1], [], []>} : vector<16x256xbf16>, vector<256x256xbf16>, vector<16x256xf32> -> vector<16x256xf32>
    %86 = vector.broadcast %11 : vector<1x256xf32> to vector<16x256xf32>
    %87 = arith.addf %85, %86 : vector<16x256xf32>
    %cst_38 = arith.constant 0.000000e+00 : f32
    %88 = vector.broadcast %cst_38 : f32 to vector<16x256xf32>
    %89 = arith.maximumf %87, %88 : vector<16x256xf32>
    %90 = vector.extract_strided_slice %89 {offsets = [0, 0], sizes = [8, 256], strides = [1, 1]} : vector<16x256xf32> to vector<8x256xf32>
    %91 = vector.broadcast %4 : vector<8x1xf32> to vector<8x256xf32>
    %92 = arith.mulf %91, %90 : vector<8x256xf32>
    %93 = vector.extract_strided_slice %89 {offsets = [8, 0], sizes = [8, 256], strides = [1, 1]} : vector<16x256xf32> to vector<8x256xf32>
    %94 = vector.broadcast %8 : vector<8x1xf32> to vector<8x256xf32>
    %95 = arith.mulf %94, %93 : vector<8x256xf32>
    %96 = arith.addf %92, %95 : vector<8x256xf32>
    %97 = arith.addf %69, %24 : vector<8x256xf32>
    %98 = vector.broadcast %12 : vector<1x256xf32> to vector<8x256xf32>
    %99 = arith.addf %97, %98 : vector<8x256xf32>
    %100 = arith.addf %99, %96 : vector<8x256xf32>
    %cst_39 = arith.constant 0.000000e+00 : f32
    %101 = vector.broadcast %cst_39 : f32 to vector<8x256xf32>
    %102 = arith.maximumf %100, %101 : vector<8x256xf32>
    %103 = arith.truncf %102 : vector<8x256xf32> to vector<8x256xbf16>
    %c0_40 = arith.constant 0 : index
    %c0_41 = arith.constant 0 : index
    %104 = vector.load %arg4[%c0_40, %c0_41] : memref<256x768xbf16, #tpu.memory_space<vmem>>, vector<256x768xbf16>
    %cst_42 = arith.constant dense<0.000000e+00> : vector<8x768xf32>
    %105 = tpu.matmul %103, %104, %cst_42 {dimension_numbers = #tpu.dot_dimension_numbers<[1], [0], [0], [1], [0, 0, 1, 1], [], []>} : vector<8x256xbf16>, vector<256x768xbf16>, vector<8x768xf32> -> vector<8x768xf32>
    %106 = vector.extract_strided_slice %105 {offsets = [0, 0], sizes = [8, 256], strides = [1, 1]} : vector<8x768xf32> to vector<8x256xf32>
    %107 = vector.extract_strided_slice %105 {offsets = [0, 256], sizes = [8, 256], strides = [1, 1]} : vector<8x768xf32> to vector<8x256xf32>
    %108 = vector.extract_strided_slice %105 {offsets = [0, 512], sizes = [8, 256], strides = [1, 1]} : vector<8x768xf32> to vector<8x256xf32>
    %c1_i32_43 = arith.constant 1 : i32
    %109 = tpu.dynamic_rotate %107 by %c1_i32_43 dim 0 : vector<8x256xf32>, i32 -> vector<8x256xf32>
    %c7_i32_44 = arith.constant 7 : i32
    %110 = tpu.dynamic_rotate %107 by %c7_i32_44 dim 0 : vector<8x256xf32>, i32 -> vector<8x256xf32>
    %111 = arith.addf %106, %109 : vector<8x256xf32>
    %112 = vector.broadcast %10 : vector<1x256xf32> to vector<8x256xf32>
    %113 = arith.addf %111, %112 : vector<8x256xf32>
    %cst_45 = arith.constant 0.000000e+00 : f32
    %114 = vector.broadcast %cst_45 : f32 to vector<8x256xf32>
    %115 = arith.maximumf %113, %114 : vector<8x256xf32>
    %116 = arith.addf %106, %110 : vector<8x256xf32>
    %117 = vector.broadcast %10 : vector<1x256xf32> to vector<8x256xf32>
    %118 = arith.addf %116, %117 : vector<8x256xf32>
    %cst_46 = arith.constant 0.000000e+00 : f32
    %119 = vector.broadcast %cst_46 : f32 to vector<8x256xf32>
    %120 = arith.maximumf %118, %119 : vector<8x256xf32>
    %121 = tpu.concatenate %115, %120 in 0 : vector<8x256xf32>, vector<8x256xf32> -> vector<16x256xf32>
    %122 = arith.truncf %121 : vector<16x256xf32> to vector<16x256xbf16>
    %c0_47 = arith.constant 0 : index
    %c0_48 = arith.constant 0 : index
    %123 = vector.load %arg6[%c0_47, %c0_48] : memref<256x256xbf16, #tpu.memory_space<vmem>>, vector<256x256xbf16>
    %cst_49 = arith.constant dense<0.000000e+00> : vector<16x256xf32>
    %124 = tpu.matmul %122, %123, %cst_49 {dimension_numbers = #tpu.dot_dimension_numbers<[1], [0], [0], [1], [0, 0, 1, 1], [], []>} : vector<16x256xbf16>, vector<256x256xbf16>, vector<16x256xf32> -> vector<16x256xf32>
    %125 = vector.broadcast %11 : vector<1x256xf32> to vector<16x256xf32>
    %126 = arith.addf %124, %125 : vector<16x256xf32>
    %cst_50 = arith.constant 0.000000e+00 : f32
    %127 = vector.broadcast %cst_50 : f32 to vector<16x256xf32>
    %128 = arith.maximumf %126, %127 : vector<16x256xf32>
    %129 = vector.extract_strided_slice %128 {offsets = [0, 0], sizes = [8, 256], strides = [1, 1]} : vector<16x256xf32> to vector<8x256xf32>
    %130 = vector.broadcast %4 : vector<8x1xf32> to vector<8x256xf32>
    %131 = arith.mulf %130, %129 : vector<8x256xf32>
    %132 = vector.extract_strided_slice %128 {offsets = [8, 0], sizes = [8, 256], strides = [1, 1]} : vector<16x256xf32> to vector<8x256xf32>
    %133 = vector.broadcast %8 : vector<8x1xf32> to vector<8x256xf32>
    %134 = arith.mulf %133, %132 : vector<8x256xf32>
    %135 = arith.addf %131, %134 : vector<8x256xf32>
    %136 = arith.addf %108, %24 : vector<8x256xf32>
    %137 = vector.broadcast %12 : vector<1x256xf32> to vector<8x256xf32>
    %138 = arith.addf %136, %137 : vector<8x256xf32>
    %139 = arith.addf %138, %135 : vector<8x256xf32>
    %cst_51 = arith.constant 0.000000e+00 : f32
    %140 = vector.broadcast %cst_51 : f32 to vector<8x256xf32>
    %141 = arith.maximumf %139, %140 : vector<8x256xf32>
    %cst_52 = arith.constant dense<0.000000e+00> : vector<256xf32>
    %142 = vector.multi_reduction <add>, %141, %cst_52 [0] : vector<8x256xf32> to vector<256xf32>
    %143 = vector.shape_cast %142 : vector<256xf32> to vector<1x256xf32>
    %cst_53 = arith.constant 8.000000e+00 : f32
    %144 = vector.broadcast %cst_53 : f32 to vector<1x256xf32>
    %145 = arith.divf %143, %144 : vector<1x256xf32>
    %146 = arith.truncf %145 : vector<1x256xf32> to vector<1x256xbf16>
    %c0_54 = arith.constant 0 : index
    %c0_55 = arith.constant 0 : index
    %147 = vector.load %arg10[%c0_54, %c0_55] : memref<256x512xbf16, #tpu.memory_space<vmem>>, vector<256x512xbf16>
    %cst_56 = arith.constant dense<0.000000e+00> : vector<1x512xf32>
    %148 = tpu.matmul %146, %147, %cst_56 {dimension_numbers = #tpu.dot_dimension_numbers<[1], [0], [0], [1], [0, 0, 1, 1], [], []>} : vector<1x256xbf16>, vector<256x512xbf16>, vector<1x512xf32> -> vector<1x512xf32>
    %149 = arith.addf %148, %13 : vector<1x512xf32>
    %cst_57 = arith.constant dense<0xFF800000> : vector<1xf32>
    %150 = vector.multi_reduction <maximumf>, %149, %cst_57 [1] : vector<1x512xf32> to vector<1xf32>
    %151 = vector.shape_cast %150 : vector<1xf32> to vector<1x1xf32>
    %152 = vector.broadcast %151 : vector<1x1xf32> to vector<1x512xf32>
    %153 = arith.subf %149, %152 : vector<1x512xf32>
    %154 = math.exp %153 : vector<1x512xf32>
    %cst_58 = arith.constant dense<0.000000e+00> : vector<1xf32>
    %155 = vector.multi_reduction <add>, %154, %cst_58 [1] : vector<1x512xf32> to vector<1xf32>
    %156 = vector.shape_cast %155 : vector<1xf32> to vector<1x1xf32>
    %157 = math.log %156 : vector<1x1xf32>
    %158 = vector.broadcast %157 : vector<1x1xf32> to vector<1x512xf32>
    %159 = arith.subf %153, %158 : vector<1x512xf32>
    %160 = vector.shape_cast %159 : vector<1x512xf32> to vector<1x512xf32>
    %161 = vector.broadcast %160 : vector<1x512xf32> to vector<8x512xf32>
    %c0_59 = arith.constant 0 : index
    %c0_60 = arith.constant 0 : index
    %162 = vector.load %arg12[%c0_59, %c0_60] : memref<8x512xf32, #tpu.memory_space<vmem>>, vector<8x512xf32>
    tpu.vector_store %arg12[%c0_59, %c0_60], %161 {strides = array<i32>} : memref<8x512xf32, #tpu.memory_space<vmem>>, vector<8x512xf32>,
    return
  }
  func.func @transform_0(%arg0: i32) -> (i32, i32) {
    %c0_i32 = arith.constant 0 : i32
    %c0_i32_0 = arith.constant 0 : i32
    return %arg0, %c0_i32 : i32, i32
  }
  func.func @transform_1(%arg0: i32) -> (i32, i32) {
    %c0_i32 = arith.constant 0 : i32
    %c0_i32_0 = arith.constant 0 : i32
    %c0_i32_1 = arith.constant 0 : i32
    return %c0_i32, %c0_i32_0 : i32, i32
  }
  func.func @transform_2(%arg0: i32) -> (i32, i32) {
    %c0_i32 = arith.constant 0 : i32
    %c0_i32_0 = arith.constant 0 : i32
    %c0_i32_1 = arith.constant 0 : i32
    return %c0_i32, %c0_i32_0 : i32, i32
  }
  func.func @transform_3(%arg0: i32) -> (i32, i32) {
    %c0_i32 = arith.constant 0 : i32
    %c0_i32_0 = arith.constant 0 : i32
    %c0_i32_1 = arith.constant 0 : i32
    return %c0_i32, %c0_i32_0 : i32, i32
  }
  func.func @transform_4(%arg0: i32) -> (i32, i32) {
    %c0_i32 = arith.constant 0 : i32
    %c0_i32_0 = arith.constant 0 : i32
    %c0_i32_1 = arith.constant 0 : i32
    return %c0_i32, %c0_i32_0 : i32, i32
  }
  func.func @transform_5(%arg0: i32) -> (i32, i32) {
    %c0_i32 = arith.constant 0 : i32
    %c0_i32_0 = arith.constant 0 : i32
    %c0_i32_1 = arith.constant 0 : i32
    return %c0_i32, %c0_i32_0 : i32, i32
  }
  func.func @transform_6(%arg0: i32) -> (i32, i32) {
    %c0_i32 = arith.constant 0 : i32
    %c0_i32_0 = arith.constant 0 : i32
    %c0_i32_1 = arith.constant 0 : i32
    return %c0_i32, %c0_i32_0 : i32, i32
  }
  func.func @transform_7(%arg0: i32) -> (i32, i32) {
    %c0_i32 = arith.constant 0 : i32
    %c0_i32_0 = arith.constant 0 : i32
    %c0_i32_1 = arith.constant 0 : i32
    return %c0_i32, %c0_i32_0 : i32, i32
  }
  func.func @transform_8(%arg0: i32) -> (i32, i32) {
    %c0_i32 = arith.constant 0 : i32
    %c0_i32_0 = arith.constant 0 : i32
    %c0_i32_1 = arith.constant 0 : i32
    return %c0_i32, %c0_i32_0 : i32, i32
  }
  func.func @transform_9(%arg0: i32) -> (i32, i32) {
    %c0_i32 = arith.constant 0 : i32
    %c0_i32_0 = arith.constant 0 : i32
    %c0_i32_1 = arith.constant 0 : i32
    return %c0_i32, %c0_i32_0 : i32, i32
  }
  func.func @transform_10(%arg0: i32) -> (i32, i32) {
    %c0_i32 = arith.constant 0 : i32
    %c0_i32_0 = arith.constant 0 : i32
    %c0_i32_1 = arith.constant 0 : i32
    return %c0_i32, %c0_i32_0 : i32, i32
  }
  func.func @transform_11(%arg0: i32) -> (i32, i32) {
    %c0_i32 = arith.constant 0 : i32
    %c0_i32_0 = arith.constant 0 : i32
    return %arg0, %c0_i32 : i32, i32
  }
}

</mosaic_0001>

<bundles_post_ra>
// kernel: tpu_custom_call.1
= control target key start
LH: loop header
LB: loop body
LE: loop exit
PB: predicated region body
PF: predicated region fallthrough
CT: control target
= control target key end

     0   :  { %s5141_s0 = inlined_call_operand.hbm [shape: f32[16,128], index: 0, kind: input, shape index: {}]   ;;  %s5142_s1 = inlined_call_operand.hbm [shape: bf16[128,256], index: 1, kind: input, shape index: {}]   ;;  %s5143_s2 = inlined_call_operand.vmem [shape: f32[1,256], index: 2, kind: input, shape index: {}]   ;;  %s5144_s3 = inlined_call_operand.hbm [shape: bf16[256,768], index: 3, kind: input, shape index: {}]   ;;  %s5145_s4 = inlined_call_operand.vmem [shape: f32[1,256], index: 4, kind: input, shape index: {}]   ;;  %s5146_s5 = inlined_call_operand.hbm [shape: bf16[256,256], index: 5, kind: input, shape index: {}]   ;;  %s5147_s6 = inlined_call_operand.vmem [shape: f32[1,256], index: 6, kind: input, shape index: {}]   ;;  %s5148_s7 = inlined_call_operand.hbm [shape: bf16[256,256], index: 7, kind: input, shape index: {}]   ;;  %s5149_s8 = inlined_call_operand.vmem [shape: f32[1,256], index: 8, kind: input, shape index: {}]   ;;  %s5150_s9 = inlined_call_operand.hbm [shape: bf16[256,512], index: 9, kind: input, shape index: {}]   ;;  %s5151_s10 = inlined_call_operand.vmem [shape: f32[1,512], index: 10, kind: input, shape index: {}]   ;;  %s5152_s11 = inlined_call_operand.hbm [shape: f32[16,512], index: 11, kind: output, shape index: {}]  }
   0x1   :  { %5292 = sst [smem:[#allocation96_spill]] %s5142_s1 }
   0x2   :  { %5293 = sst [smem:[#allocation97_spill]] %s5146_s5 }
   0x3   :  { %5294 = sst [smem:[#allocation98_spill]] %s5149_s8 }
   0x4   :  { %5295 = sst [smem:[#allocation99_spill]] %s5151_s10 }
   0x5   :  { %5296 = sst [smem:[#allocation100_spill]] %s5152_s11 }
   0x6   :  { %16 = vsyncpa [#allocation3], 0 }
   0x7   :  { %18 = vsyncpa [#allocation3 + $0x1], 0 }
   0x8   :  { %19 = vsyncpa [#allocation6], 0 }
   0x9   :  { %20 = vsyncpa [#allocation9], 0 }
   0xa   :  { %21 = vsyncpa [#allocation12], 0 }
   0xb   :  { %22 = vsyncpa [#allocation4], 0 }
   0xc   :  { %24 = vsyncpa [#allocation4 + $0x1], 0  ;;  %s4086_s17 = smov 0   ;;  %s4088_s18 = smov 0  }
   0xd   :  { %s4090_s19 = smov 0   ;;  %s4092_s20 = smov 0  }
   0xe LB: > { %s4011_s21 = smov [#allocation5]   ;;  %s4107_s23 = sadd.s32 4294967295, %s4009_s20   ;;  %s4009_s20 = sphi %s4092_s20, %s5523_s20   ;;  %s4005_s19 = sphi %s4090_s19, %s5522_s19   ;;  %s4001_s18 = sphi %s4088_s18, %s5521_s18   ;;  %s3997_s17 = sphi %s4086_s17, %s5520_s17  }
   0xf   : > { %s309_s22 = sshll.u32 %s4011_s21, 4  ;;  %p2982_p0 = scmp.ge.s32.totalorder %s4009_s20, 1  ;;  %s4112_s22 = int_to_ptr.vmem [resolvable:$true] %s309_s22 }
  0x10   : > { %p5156_p1 = scmp.eq.s32.totalorder %s4107_s23, 0  ;;  %p297_p2 = scmp.lt.s32.totalorder %s4009_s20, 3 }
  0x11   : > { %s4012_s25 = smov [#allocation8]   ;;  %s4013_s28 = smov [#allocation7]  }
  0x12   : > { %p4114_p3 = pnand %p2982_p0, %p297_p2  ;;  %s341_s26 = sshll.u32 %s4012_s25, 4  ;;  %s4127_s26 = int_to_ptr.vmem [resolvable:$true] %s341_s26 }
  0x13   : > { %s325_s29 = sshll.u32 %s4013_s28, 4  ;;  %s5299_s1 = sld [smem:[#allocation96_spill]]  ;;  %s4129_s29 = int_to_ptr.vmem [resolvable:$true] %s325_s29 }
  0x14   : > { %s5297_s24 = scalar_select %p4114_p3, 1, 0 }
  0x15   : > { %p3271_p5 = pneg %p4114_p3 }
  0x17   : > { %p4123_p6 = pnand %p3271_p5, %p5156_p1 }
  0x19   : > { %s3761_s13 = scalar_lea.hbm %s5299_s1, 2048  ;;  %p4139_p8 = pneg %p4123_p6 }
  0x1a   : > { %p3762_p7 = scmp.ne.s32.totalorder %s5299_s1, %s3761_s13  ;;  %p3768_p11 = scmp.lt.u32.totalorder %s3761_s13, %s5299_s1 }
  0x1c   : > { %p3764_p9 = pnand %p4139_p8, %p3762_p7 }
  0x1e   : > { %p3765_p10 = pneg %p3764_p9 }
  0x20   : > { %p3770_p12 = pnand %p3768_p11, %p3765_p10 }
  0x22   : > { %3773 = shalt.err (!%p3770_p12)
}
  0x23   : > { %s3774_s28 = scalar_lea.vmem %s4112_s22, 2048  ;;  %p3782_p5 = scmp.lt.s32.totalorder %s4112_s22, %s4112_s22 }
  0x24   : > { %p3775_p13 = scmp.ne.s32.totalorder %s4112_s22, %s3774_s28  ;;  %p3783_p4 = scmp.lt.s32.totalorder %s3774_s28, %s3774_s28 }
  0x26   : > { %p3777_p0 = pnand %p3775_p13, %p4139_p8  ;;  %p3784_p7 = por %p3783_p4, %p3782_p5 }
  0x28   : > { %p3778_p2 = pneg %p3777_p0 }
  0x2a   : > { %p3785_p9 = pnand %p3784_p7, %p3778_p2 }
  0x2c   : > { %3788 = shalt.err (!%p3785_p9)
}
  0x2d   : > { %s5154_s30 = smov 128   ;;  %s5155_s12 = smov 8  }
  0x2e   : > { %3274 = dma.hbm_to_vmem [thread:$0]  (!%p4123_p6), %s5299_s1, 2048, %s4112_s22, [#allocation6], %s5154_s30, %s5154_s30, %s5155_s12  }
  0x2f   : > { %s5301_s5 = sld [smem:[#allocation97_spill]] }
  0x35   : > { %s3789_s25 = scalar_lea.hbm %s5301_s5, 4096 }
  0x36   : > { %p3790_p4 = scmp.ne.s32.totalorder %s5301_s5, %s3789_s25  ;;  %p3796_p12 = scmp.lt.u32.totalorder %s3789_s25, %s5301_s5 }
  0x38   : > { %p3792_p10 = pnand %p3790_p4, %p4139_p8 }
  0x3a   : > { %p3793_p11 = pneg %p3792_p10 }
  0x3c   : > { %p3798_p13 = pnand %p3796_p12, %p3793_p11 }
  0x3e   : > { %3801 = shalt.err (!%p3798_p13)
}
  0x3f   : > { %s3802_s22 = scalar_lea.vmem %s4127_s26, 4096  ;;  %p3810_p7 = scmp.lt.s32.totalorder %s4127_s26, %s4127_s26 }
  0x40   : > { %p3803_p0 = scmp.ne.s32.totalorder %s4127_s26, %s3802_s22  ;;  %p3811_p9 = scmp.lt.s32.totalorder %s3802_s22, %s3802_s22 }
  0x42   : > { %p3805_p2 = pnand %p3803_p0, %p4139_p8  ;;  %p3812_p4 = por %p3811_p9, %p3810_p7 }
  0x44   : > { %p3806_p5 = pneg %p3805_p2 }
  0x46   : > { %p3813_p10 = pnand %p3812_p4, %p3806_p5 }
  0x48   : > { %3816 = shalt.err (!%p3813_p10)
}
  0x49   : > { %3280 = dma.hbm_to_vmem [thread:$0]  (!%p4123_p6), %s5301_s5, 4096, %s4127_s26, [#allocation9], %s5154_s30, %s5154_s30, %s5155_s12  }
  0x4a   : > { %s3817_s14 = scalar_lea.hbm %s5144_s3, 12288 }
  0x4b   : > { %p3818_p11 = scmp.ne.s32.totalorder %s5144_s3, %s3817_s14  ;;  %p3824_p0 = scmp.lt.u32.totalorder %s3817_s14, %s5144_s3 }
  0x4d   : > { %p3820_p12 = pnand %p3818_p11, %p4139_p8 }
  0x4f   : > { %p3821_p13 = pneg %p3820_p12 }
  0x51   : > { %p3826_p2 = pnand %p3824_p0, %p3821_p13 }
  0x53   : > { %3829 = shalt.err (!%p3826_p2)
}
  0x54   : > { %s3830_s26 = scalar_lea.vmem %s4129_s29, 12288  ;;  %p3838_p4 = scmp.lt.s32.totalorder %s4129_s29, %s4129_s29 }
  0x55   : > { %p3831_p5 = scmp.ne.s32.totalorder %s4129_s29, %s3830_s26  ;;  %p3839_p10 = scmp.lt.s32.totalorder %s3830_s26, %s3830_s26 }
  0x57   : > { %p3833_p7 = pnand %p3831_p5, %p4139_p8  ;;  %p3840_p11 = por %p3839_p10, %p3838_p4 }
  0x59   : > { %p3834_p9 = pneg %p3833_p7 }
  0x5b   : > { %p3841_p12 = pnand %p3840_p11, %p3834_p9 }
  0x5d   : > { %3844 = shalt.err (!%p3841_p12)
}
  0x5e   : > { %s4016_s22 = smov 384   ;;  %s4017_s8 = smov 24  }
  0x5f   : > { %3277 = dma.hbm_to_vmem [thread:$0]  (!%p4123_p6), %s5144_s3, 12288, %s4129_s29, [#allocation6], %s4016_s22, %s4016_s22, %s4017_s8  }
  0x60   : > { %s4018_s13 = smov [#allocation10]   ;;  %s4019_s15 = smov [#allocation11]  }
  0x61   : > { %s357_s14 = sshll.u32 %s4018_s13, 4  ;;  %s373_s21 = sshll.u32 %s4019_s15, 4  ;;  %s358_s14 = int_to_ptr.vmem [resolvable:$true] %s357_s14  ;;  %s374_s21 = int_to_ptr.vmem [resolvable:$true] %s373_s21 }
  0x62   : > { %s3845_s26 = scalar_lea.hbm %s5148_s7, 4096 }
  0x63   : > { %p3846_p13 = scmp.ne.s32.totalorder %s5148_s7, %s3845_s26  ;;  %p3852_p5 = scmp.lt.u32.totalorder %s3845_s26, %s5148_s7 }
  0x65   : > { %p3848_p0 = pnand %p3846_p13, %p4139_p8 }
  0x67   : > { %p3849_p2 = pneg %p3848_p0 }
  0x69   : > { %p3854_p7 = pnand %p3852_p5, %p3849_p2 }
  0x6b   : > { %3857 = shalt.err (!%p3854_p7)
}
  0x6c   : > { %s3858_s29 = scalar_lea.vmem %s358_s14, 4096  ;;  %p3866_p11 = scmp.lt.s32.totalorder %s358_s14, %s358_s14 }
  0x6d   : > { %p3859_p9 = scmp.ne.s32.totalorder %s358_s14, %s3858_s29  ;;  %p3867_p12 = scmp.lt.s32.totalorder %s3858_s29, %s3858_s29 }
  0x6f   : > { %p3861_p4 = pnand %p3859_p9, %p4139_p8  ;;  %p3868_p1 = por %p3867_p12, %p3866_p11 }
  0x71   : > { %p3862_p10 = pneg %p3861_p4 }
  0x73   : > { %p3869_p3 = pnand %p3868_p1, %p3862_p10 }
  0x75   : > { %3872 = shalt.err (!%p3869_p3)
}
  0x76   : > { %s5302_s30 = smov 8   ;;  %s5303_s12 = smov 128  }
  0x77   : > { %3283 = dma.hbm_to_vmem [thread:$0]  (!%p4123_p6), %s5148_s7, 4096, %s358_s14, [#allocation9], %s5303_s12, %s5303_s12, %s5302_s30  }
  0x78   : > { %s3873_s10 = scalar_lea.hbm %s5150_s9, 8192 }
  0x79   : > { %p3874_p1 = scmp.ne.s32.totalorder %s5150_s9, %s3873_s10  ;;  %p3880_p0 = scmp.lt.u32.totalorder %s3873_s10, %s5150_s9 }
  0x7b   : > { %p3876_p3 = pnand %p3874_p1, %p4139_p8 }
  0x7d   : > { %p3877_p13 = pneg %p3876_p3 }
  0x7f   : > { %p3882_p2 = pnand %p3880_p0, %p3877_p13 }
  0x81   : > { %3885 = shalt.err (!%p3882_p2)
}
  0x82   : > { %s3886_s28 = scalar_lea.vmem %s374_s21, 8192  ;;  %p3894_p4 = scmp.lt.s32.totalorder %s374_s21, %s374_s21 }
  0x83   : > { %p3887_p5 = scmp.ne.s32.totalorder %s374_s21, %s3886_s28  ;;  %p3895_p10 = scmp.lt.s32.totalorder %s3886_s28, %s3886_s28 }
  0x85   : > { %p3889_p7 = pnand %p3887_p5, %p4139_p8  ;;  %p3896_p11 = por %p3895_p10, %p3894_p4 }
  0x87   : > { %p3890_p9 = pneg %p3889_p7 }
  0x89   : > { %p3897_p12 = pnand %p3896_p11, %p3890_p9 }
  0x8b   : > { %3900 = shalt.err (!%p3897_p12)
}
  0x8c   : > { %s4020_s14 = smov 256   ;;  %s4021_s16 = smov 16  }
  0x8d   : > { %3286 = dma.hbm_to_vmem [thread:$0]  (!%p4123_p6), %s5150_s9, 8192, %s374_s21, [#allocation12], %s4020_s14, %s4020_s14, %s4021_s16  }
  0x8e   : > { %s2981_s30 = sadd.s32 4294967294, %s4009_s20   ;;  %s4253_s12 = sadd.s32 1, %s4009_s20  }
  0x8f   : > { %s37_s1 = sadd.s32 1, %s4005_s19  ;;  %s34_s5 = ssub.s32 %s4009_s20, %s4253_s12 }
  0x90   : > { %p44_p8 = scmp.ne.s32.totalorder %s4005_s19, %s4001_s18  ;;  %p35_p1 = scmp.eq.s32.totalorder %s34_s5, 0 }
  0x91   : > { %p45_p3 = scmp.eq.s32.totalorder %s4009_s20, 0  ;;  %p50_p13 = scmp.ne.s32.totalorder %s4001_s18, %s3997_s17 }
  0x92   : > { %p284_p0 = scmp.eq.s32.totalorder %s4107_s23, 1  ;;  %p5304_p5 = scmp.eq.s32.totalorder %s4107_s23, 0 }
  0x93   : > { %s4265_s22 = scalar_select %p35_p1, %s4005_s19, %s37_s1  }
  0x94   : > { %p46_p2 = por %p45_p3, %p44_p8  ;;  %p4269_p7 = por %p5304_p5, %p50_p13 }
  0x95   : > { %p4273_p6 = por %p284_p0, %p44_p8  ;;  %p290_p9 = scmp.eq.s32.totalorder %s2981_s30, 1 }
  0x96   : > { %p3300_p4 = scmp.lt.s32.totalorder %s4009_s20, 2  ;;  %s390_s8 = sand.u32 1, %s4005_s19  }
  0x97   : > { %s5306_s21 = scalar_select %p4273_p6, 1, 0 }
  0x98   : > { %p4279_p10 = por %p290_p9, %p50_p13  ;;  %s2989_s11 = sshll.u32 %s390_s8, 3 }
  0x99   : > { %s2990_s13 = sshll.u32 %s4009_s20, 7  ;;  %s394_s14 = scalar_lea.vmem [#allocation2], %s2989_s11 }
  0x9a   : > { %s5307_s10 = scalar_select %p4279_p10, 1, 0 }
  0x9b   : > { %s4287_s28 = scalar_lea.hbm %s5141_s0, %s2990_s13  ;;  %s401_s16 = sshll.u32 %s394_s14, 4  ;;  %s4293_s16 = int_to_ptr.vmem [resolvable:$true] %s401_s16 }
  0x9c   : > { %p4289_p11 = pnand %p3300_p4, %p46_p2  ;;  %s391_s29 = scalar_lea.sflag [#allocation3], %s390_s8 }
  0x9d   : > { %s3901_s30 = scalar_lea.hbm %s4287_s28, 128  ;;  %s3906_s11 = scalar_lea.hbm %s5141_s0, 256 }
  0x9e   : > { %p3902_p12 = scmp.ne.s32.totalorder %s4287_s28, %s3901_s30  ;;  %p3903_p8 = pneg %p4289_p11 }
  0x9f   : > { %p3907_p13 = scmp.lt.u32.totalorder %s4287_s28, %s5141_s0  ;;  %p3908_p0 = scmp.lt.u32.totalorder %s3906_s11, %s3901_s30 }
  0xa0   : > { %p3904_p1 = pnand %p3903_p8, %p3902_p12  ;;  %p3910_p5 = scmp.lt.u32.totalorder %s3901_s30, %s4287_s28 }
  0xa1   : > { %p3909_p2 = por %p3908_p0, %p3907_p13 }
  0xa2   : > { %p3905_p3 = pneg %p3904_p1 }
  0xa3   : > { %p3911_p9 = por %p3910_p5, %p3909_p2 }
  0xa5   : > { %p3912_p4 = pnand %p3911_p9, %p3905_p3 }
  0xa7   : > { %3915 = shalt.err (!%p3912_p4)
}
  0xa8   : > { %s3916_s8 = scalar_lea.vmem %s4293_s16, 128  ;;  %s4022_s25 = smov [#allocation2]  }
  0xa9   : > { %p3917_p12 = scmp.ne.s32.totalorder %s4293_s16, %s3916_s8  ;;  %s3921_s14 = sshll.u32 %s4022_s25, 4  ;;  %s3922_s14 = int_to_ptr.vmem [resolvable:$false] %s3921_s14 }
  0xaa   : > { %s3923_s1 = scalar_lea.vmem %s3922_s14, 256  ;;  %p3924_p6 = scmp.lt.s32.totalorder %s4293_s16, %s3922_s14 }
  0xab   : > { %p3919_p1 = pnand %p3917_p12, %p3903_p8  ;;  %p3925_p13 = scmp.lt.s32.totalorder %s3923_s1, %s3916_s8 }
  0xad   : > { %p3920_p10 = pneg %p3919_p1  ;;  %p3926_p0 = por %p3925_p13, %p3924_p6 }
  0xaf   : > { %p3927_p2 = pnand %p3926_p0, %p3920_p10 }
  0xb1   : > { %3930 = shalt.err (!%p3927_p2)
}
  0xb2   : > { %3290 = dma.hbm_to_vmem [thread:$0]  (!%p4289_p11), %s4287_s28, 128, %s4293_s16, %s391_s29  }
  0xb3   : > { %p5309_p3 = scmp.ne.s32.totalorder %s5297_s24, 0 }
  0xb5   : > { %410 = sbr.rel (%p5309_p3) target bundleno = 2453 (0x995), region = 64 }
  0xbc   : > { %s4323_s30 = sand.u32 1, %s4001_s18  }
  0xbd   : > { %s2992_s5 = sshll.u32 %s4323_s30, 3  ;;  %s413_s11 = scalar_lea.sflag [#allocation3], %s4323_s30 }
  0xbe   : > { %s4327_s13 = scalar_lea.vmem [#allocation2], %s2992_s5 }
  0xbf   : > { %3976 = dma.done.wait (%p4269_p7), %s413_s11, 128  }
  0xc0   : > { %3978 = vsyncadd (%p4269_p7), %s413_s11, 4294967168  ;;  %p5310_p6 = scmp.eq.s32.totalorder %s4107_s23, 0 }
  0xc2   : > { %3980 = dma.done.wait (%p5310_p6), [#allocation6], 14336   ;;  %p5311_p10 = pmov %p5310_p6 }
  0xc3   : > { %p5312_p11 = pmov %p5310_p6 }
  0xc4   : > { %3982 = vsyncadd (%p5311_p10), [#allocation6], 4294952960 }
  0xc5   : > { %3984 = dma.done.wait (%p5312_p11), [#allocation9], 8192   ;;  %p5313_p8 = pmov %p5310_p6 }
  0xc6   : > { %p5314_p5 = pmov %p5310_p6 }
  0xc7   : > { %3986 = vsyncadd (%p5313_p8), [#allocation9], 4294959104 }
  0xc8   : > { %3988 = dma.done.wait (%p5314_p5), [#allocation12], 8192   ;;  %p5315_p9 = pmov %p5314_p5 }
  0xc9   : > { %v4023_v0 = vmov 0   ;;  %v3352_v1 = vld [vmem:[#allocation5 + $0x4] ss:$8 sps:$4 sm:$0xff]   ;;  %v3354_v2 = vld [vmem:[#allocation5] ss:$8 sps:$4 sm:$0xff]   ;;  %v489_v26 = vld [vmem:[%s4327_s13] sm:$0xff] }
  0xca   : > { %3990 = vsyncadd (%p5315_p9), [#allocation12], 4294959104  ;;  %630 = vmatprep.mubr.bf16.mxu0 %v4023_v0  ;;  %598 = vmatprep.subr.bf16.mxu0 %v3352_v1  ;;  %v3355_v3 = vld [vmem:[#allocation5 + $0x14] ss:$8 sps:$4 sm:$0xff]   ;;  %v3357_v4 = vld [vmem:[#allocation5 + $0x10] ss:$8 sps:$4 sm:$0xff]   ;;  %v490_v30 = vpack.c.bf16 %v489_v26, %v489_v26 }
  0xcb   : > { %599 = vmatpush1.bf16.msra.mxu0 %v3354_v2  ;;  %v3358_v5 = vld [vmem:[#allocation5 + $0x24] ss:$8 sps:$4 sm:$0xff]   ;;  %v3360_v6 = vld [vmem:[#allocation5 + $0x20] ss:$8 sps:$4 sm:$0xff]   ;;  %v3361_v7 = vld [vmem:[#allocation5 + $0x34] ss:$8 sps:$4 sm:$0xff]  }
  0xcc   : > { %600 = vmatprep.subr.bf16.mxu0 %v3355_v3  ;;  %v3363_v8 = vld [vmem:[#allocation5 + $0x30] ss:$8 sps:$4 sm:$0xff]   ;;  %v3376_v9 = vld [vmem:[#allocation10 + $0x4] ss:$8 sps:$4 sm:$0xff]   ;;  %v3381_v11 = vld [vmem:[#allocation10] ss:$8 sps:$4 sm:$0xff]  }
  0xcd   : > { %v3364_v10 = vld [vmem:[#allocation5 + $0x44] ss:$8 sps:$4 sm:$0xff]   ;;  %835 = vmatprep.subr.bf16.mxu1 %v3376_v9  ;;  %v3382_v12 = vld [vmem:[#allocation10 + $0x14] ss:$8 sps:$4 sm:$0xff]   ;;  %v3366_v13 = vld [vmem:[#allocation5 + $0x40] ss:$8 sps:$4 sm:$0xff]  }
  0xce   : > { %v3367_v14 = vld [vmem:[#allocation5 + $0x54] ss:$8 sps:$4 sm:$0xff]   ;;  %836 = vmatpush1.bf16.msra.mxu1 %v3381_v11  ;;  %v3387_v15 = vld [vmem:[#allocation10 + $0x10] ss:$8 sps:$4 sm:$0xff]   ;;  %v3388_v16 = vld [vmem:[#allocation10 + $0x24] ss:$8 sps:$4 sm:$0xff]  }
  0xcf   : > { %601 = vmatpush1.bf16.msra.mxu0 %v3357_v4  ;;  %837 = vmatprep.subr.bf16.mxu1 %v3382_v12  ;;  %v3369_v17 = vld [vmem:[#allocation5 + $0x50] ss:$8 sps:$4 sm:$0xff]   ;;  %v3370_v18 = vld [vmem:[#allocation5 + $0x64] ss:$8 sps:$4 sm:$0xff]   ;;  %v3393_v19 = vld [vmem:[#allocation10 + $0x20] ss:$8 sps:$4 sm:$0xff]  }
  0xd0   : > { %602 = vmatprep.subr.bf16.mxu0 %v3358_v5  ;;  %v3394_v20 = vld [vmem:[#allocation10 + $0x34] ss:$8 sps:$4 sm:$0xff]   ;;  %v3372_v21 = vld [vmem:[#allocation5 + $0x60] ss:$8 sps:$4 sm:$0xff]   ;;  %v3399_v23 = vld [vmem:[#allocation10 + $0x30] ss:$8 sps:$4 sm:$0xff]  }
  0xd1   : > { %v3373_v22 = vld [vmem:[#allocation5 + $0x74] ss:$8 sps:$4 sm:$0xff]   ;;  %v3400_v24 = vld [vmem:[#allocation10 + $0x44] ss:$8 sps:$4 sm:$0xff]   ;;  %v3375_v25 = vld [vmem:[#allocation5 + $0x70] ss:$8 sps:$4 sm:$0xff]  }
  0xd2   : > { %838 = vmatpush1.bf16.msra.mxu1 %v3387_v15  ;;  %v4346_v27 = vld [vmem:[#allocation7 + $0x4] ss:$24 sps:$4 sm:$0xff]   ;;  %v3405_v28 = vld [vmem:[#allocation10 + $0x40] ss:$8 sps:$4 sm:$0xff]   ;;  %v4350_v32 = vld [vmem:[#allocation7 + $0x34] ss:$24 sps:$4 sm:$0xff]  }
  0xd3   : > { %603 = vmatpush1.bf16.msra.mxu0 %v3360_v6  ;;  %839 = vmatprep.subr.bf16.mxu1 %v3388_v16  ;;  %v3406_v29 = vld [vmem:[#allocation10 + $0x54] ss:$8 sps:$4 sm:$0xff]   ;;  %v4348_v31 = vld [vmem:[#allocation7] ss:$24 sps:$4 sm:$0xff]   ;;  %v3412_v34 = vld [vmem:[#allocation10 + $0x64] ss:$8 sps:$4 sm:$0xff]  }
  0xd4   : > { %604 = vmatprep.subr.bf16.mxu0 %v3361_v7  ;;  %v3411_v33 = vld [vmem:[#allocation10 + $0x50] ss:$8 sps:$4 sm:$0xff]   ;;  %v4355_v36 = vld [vmem:[#allocation7 + $0x64] ss:$24 sps:$4 sm:$0xff]   ;;  %v3417_v37 = vld [vmem:[#allocation10 + $0x60] ss:$8 sps:$4 sm:$0xff]  }
  0xd5   : > { %v4353_v35 = vld [vmem:[#allocation7 + $0x30] ss:$24 sps:$4 sm:$0xff]   ;;  %v3418_v38 = vld [vmem:[#allocation10 + $0x74] ss:$8 sps:$4 sm:$0xff]   ;;  %v4359_v39 = vld [vmem:[#allocation7 + $0x60] ss:$24 sps:$4 sm:$0xff]  }
  0xd6   : > { %840 = vmatpush1.bf16.msra.mxu1 %v3393_v19  ;;  %v4362_v40 = vld [vmem:[#allocation7 + $0x94] ss:$24 sps:$4 sm:$0xff]   ;;  %v3423_v41 = vld [vmem:[#allocation10 + $0x70] ss:$8 sps:$4 sm:$0xff]   ;;  %v4367_v44 = vld [vmem:[#allocation7 + $0xc4] ss:$24 sps:$4 sm:$0xff]  }
  0xd7   : > { %605 = vmatpush1.bf16.msra.mxu0 %v3363_v8  ;;  %841 = vmatprep.subr.bf16.mxu1 %v3394_v20  ;;  %v3424_v42 = vld [vmem:[#allocation10 + $0x84] ss:$8 sps:$4 sm:$0xff]   ;;  %v4365_v43 = vld [vmem:[#allocation7 + $0x90] ss:$24 sps:$4 sm:$0xff]   ;;  %v3430_v46 = vld [vmem:[#allocation10 + $0x94] ss:$8 sps:$4 sm:$0xff]  }
  0xd8   : > { %606 = vmatprep.subr.bf16.mxu0 %v3364_v10  ;;  %v3429_v45 = vld [vmem:[#allocation10 + $0x80] ss:$8 sps:$4 sm:$0xff]   ;;  %v3435_v48 = vld [vmem:[#allocation10 + $0x90] ss:$8 sps:$4 sm:$0xff]   ;;  %v4375_v49 = vld [vmem:[#allocation7 + $0xf4] ss:$24 sps:$4 sm:$0xff]  }
  0xd9   : > { %v4372_v47 = vld [vmem:[#allocation7 + $0xc0] ss:$24 sps:$4 sm:$0xff]   ;;  %v3436_v50 = vld [vmem:[#allocation10 + $0xa4] ss:$8 sps:$4 sm:$0xff]   ;;  %v4377_v51 = vld [vmem:[#allocation7 + $0xf0] ss:$24 sps:$4 sm:$0xff]  }
  0xda   : > { %842 = vmatpush1.bf16.msra.mxu1 %v3399_v23  ;;  %v3441_v52 = vld [vmem:[#allocation10 + $0xa0] ss:$8 sps:$4 sm:$0xff]   ;;  %v4379_v53 = vld [vmem:[#allocation7 + $0x124] ss:$24 sps:$4 sm:$0xff]   ;;  %v3447_v56 = vld [vmem:[#allocation10 + $0xb0] ss:$8 sps:$4 sm:$0xff]  }
  0xdb   : > { %607 = vmatpush1.bf16.msra.mxu0 %v3366_v13  ;;  %843 = vmatprep.subr.bf16.mxu1 %v3400_v24  ;;  %v3442_v54 = vld [vmem:[#allocation10 + $0xb4] ss:$8 sps:$4 sm:$0xff]   ;;  %v4383_v55 = vld [vmem:[#allocation7 + $0x120] ss:$24 sps:$4 sm:$0xff]   ;;  %v3448_v58 = vld [vmem:[#allocation10 + $0xc4] ss:$8 sps:$4 sm:$0xff]  }
  0xdc   : > { %608 = vmatprep.subr.bf16.mxu0 %v3367_v14  ;;  %v4385_v57 = vld [vmem:[#allocation7 + $0x154] ss:$24 sps:$4 sm:$0xff]   ;;  %v4389_v59 = vld [vmem:[#allocation7 + $0x150] ss:$24 sps:$4 sm:$0xff]   ;;  %v4391_v61 = vld [vmem:[#allocation7 + $0x184] ss:$24 sps:$4 sm:$0xff]  }
  0xdd   : > { %v3453_v60 = vld [vmem:[#allocation10 + $0xc0] ss:$8 sps:$4 sm:$0xff]   ;;  %v3454_v62 = vld [vmem:[#allocation10 + $0xd4] ss:$8 sps:$4 sm:$0xff]   ;;  %v3459_v0 = vld [vmem:[#allocation10 + $0xd0] ss:$8 sps:$4 sm:$0xff]  }
  0xde   : > { %844 = vmatpush1.bf16.msra.mxu1 %v3405_v28  ;;  %v4395_v63 = vld [vmem:[#allocation7 + $0x180] ss:$24 sps:$4 sm:$0xff]   ;;  %v4397_v1 = vld [vmem:[#allocation7 + $0x1b4] ss:$24 sps:$4 sm:$0xff]   ;;  %v4401_v2 = vld [vmem:[#allocation7 + $0x1b0] ss:$24 sps:$4 sm:$0xff]  }
  0xdf   : > { %609 = vmatpush1.bf16.msra.mxu0 %v3369_v17  ;;  %845 = vmatprep.subr.bf16.mxu1 %v3406_v29  ;;  %v4403_v3 = vld [vmem:[#allocation7 + $0x1e4] ss:$24 sps:$4 sm:$0xff]   ;;  %v4407_v4 = vld [vmem:[#allocation7 + $0x1e0] ss:$24 sps:$4 sm:$0xff]   ;;  %v4409_v5 = vld [vmem:[#allocation7 + $0x214] ss:$24 sps:$4 sm:$0xff]  }
  0xe0   : > { %610 = vmatprep.subr.bf16.mxu0 %v3370_v18  ;;  %v4413_v6 = vld [vmem:[#allocation7 + $0x210] ss:$24 sps:$4 sm:$0xff]   ;;  %v4415_v7 = vld [vmem:[#allocation7 + $0x244] ss:$24 sps:$4 sm:$0xff]   ;;  %v4419_v8 = vld [vmem:[#allocation7 + $0x240] ss:$24 sps:$4 sm:$0xff]  }
  0xe1   : > { %v4421_v9 = vld [vmem:[#allocation7 + $0x274] ss:$24 sps:$4 sm:$0xff]   ;;  %v4425_v10 = vld [vmem:[#allocation7 + $0x270] ss:$24 sps:$4 sm:$0xff]   ;;  %v4430_v12 = vld [vmem:[#allocation7 + $0x2a4] ss:$24 sps:$4 sm:$0xff]  }
  0xe2   : > { %846 = vmatpush1.bf16.msra.mxu1 %v3411_v33  ;;  %v3460_v11 = vld [vmem:[#allocation10 + $0xe4] ss:$8 sps:$4 sm:$0xff]   ;;  %5316 = vst [vmem:[#allocation19_spill] sm:$0xff] %v4430_v12  ;;  %v4432_v13 = vld [vmem:[#allocation7 + $0x2a0] ss:$24 sps:$4 sm:$0xff]   ;;  %s5405_s25 = sld [smem:[#allocation98_spill]] }
  0xe3   : > { %611 = vmatpush1.bf16.msra.mxu0 %v3372_v21  ;;  %847 = vmatprep.subr.bf16.mxu1 %v3412_v34  ;;  %5317 = vst [vmem:[#allocation20_spill] sm:$0xff] %v4432_v13  ;;  %v3465_v14 = vld [vmem:[#allocation10 + $0xe0] ss:$8 sps:$4 sm:$0xff]   ;;  %v3466_v15 = vld [vmem:[#allocation10 + $0xf4] ss:$8 sps:$4 sm:$0xff]   ;;  %v476_v21 = vlaneseq  ;;  %s5513_s5 = sld [smem:[#allocation99_spill]] }
  0xe4   : > { %612 = vmatprep.subr.bf16.mxu0 %v3373_v22  ;;  %v4436_v16 = vld [vmem:[#allocation7 + $0x2d4] ss:$24 sps:$4 sm:$0xff]   ;;  %v4438_v17 = vld [vmem:[#allocation7 + $0x2d0] ss:$24 sps:$4 sm:$0xff]   ;;  %vm2791_vm2 = vcmask 1040384   ;;  %s2998_s11 = sshll.u32 %s4323_s30, 5 }
  0xe5   : > { %5318 = vst [vmem:[#allocation21_spill] sm:$0xff] %v4436_v16  ;;  %5319 = vst [vmem:[#allocation22_spill] sm:$0xff] %v4438_v17  ;;  %v3471_v18 = vld [vmem:[#allocation10 + $0xf0] ss:$8 sps:$4 sm:$0xff]   ;;  %v4442_v19 = vld [vmem:[#allocation7 + $0xc] ss:$24 sps:$4 sm:$0xff]  }
  0xe6   : > { %848 = vmatpush1.bf16.msra.mxu1 %v3417_v37  ;;  %5320 = vst [vmem:[#allocation23_spill] sm:$0xff] %v4442_v19  ;;  %v4444_v20 = vld [vmem:[#allocation7 + $0x14] ss:$24 sps:$4 sm:$0xff]   ;;  %v4448_v22 = vshrl.u32 %v476_v21, 7  ;;  %v484_v24 = vld [vmem:[%s5143_s2] sm:$0x3] }
  0xe7   : > { %613 = vmatpush1.bf16.msra.mxu0 %v3375_v25  ;;  %849 = vmatprep.subr.bf16.mxu1 %v3418_v38  ;;  %5321 = vst [vmem:[#allocation24_spill] sm:$0xff] %v4444_v20  ;;  %v4501_v21 = vld [vmem:[#allocation7 + $0xa0] ss:$24 sps:$4 sm:$0xff]   ;;  %s3246_s13 = sshll.u32 %s4107_s23, 9  ;;  %s474_s24 = scalar_lea.vmem [#allocation13], %s2998_s11 }
  0xe8   : > { %1452 = vmatprep.subr.bf16.mxu0 %v4346_v27  ;;  %5322 = vst [vmem:[#allocation25_spill] sm:$0xff] %v4448_v22  ;;  %v4451_v23 = vsub.s32 0, %v4448_v22  ;;  %v4457_v25 = vsub.s32 1, %v4448_v22  ;;  %5331 = vst [vmem:[#allocation34_spill] sm:$0xff] %v4501_v21  ;;  %v4591_v22 = vld [vmem:[#allocation7 + $0x224] ss:$24 sps:$4 sm:$0xff]  }
  0xe9   : > { %5350 = vst [vmem:[#allocation53_spill] sm:$0xff] %v4591_v22  ;;  %s2863_s27 = sshll.u32 %s474_s24, 4  ;;  %s5516_s26 = sld [smem:[#allocation100_spill]]  ;;  %s5099_s27 = int_to_ptr.vmem [resolvable:$true] %s2863_s27 }
  0xea   : > { %631 = vmatmul.mubr.bf16.vlgmr.msra.gmra.mrb[0].mxu0 %v490_v30  ;;  %850 = vmatpush1.bf16.msra.mxu1 %v3423_v41  ;;  %5323 = vst [vmem:[#allocation26_spill] sm:$0xff] %v4451_v23  ;;  %5324 = vst [vmem:[#allocation27_spill] sm:$0xff] %v4457_v25  ;;  %v511_v26 = vrot.slane %v484_v24, %v4451_v23  ;;  %v515_v28 = vrot.slane %v484_v24, %v4457_v25  ;;  %v4505_v24 = vld [vmem:[#allocation7 + $0xcc] ss:$24 sps:$4 sm:$0xff]   ;;  %s2849_s29 = scalar_lea.sflag [#allocation4], %s4323_s30  ;;  %s3931_s15 = scalar_lea.vmem %s5099_s27, 512 }
  0xeb   : > { %1453 = vmatpush1.bf16.msra.mxu0 %v4348_v31  ;;  %851 = vmatprep.subr.bf16.mxu1 %v3424_v42  ;;  %p3932_p7 = scmp.ne.s32.totalorder %s5099_s27, %s3931_s15  ;;  %p5517_p4 = scmp.ne.s32.totalorder %s5306_s21, 0 }
  0xec   : > { %1454 = vmatprep.subr.bf16.mxu0 %v4350_v32  ;;  %s4025_s8 = smov [#allocation13]  }
  0xed   : > { %p3933_p12 = pnand %p3932_p7, %p5517_p4 }
  0xee   : > { %852 = vmatpush1.bf16.msra.mxu1 %v3429_v45 }
  0xef   : > { %1455 = vmatpush1.bf16.msra.mxu0 %v4353_v35  ;;  %853 = vmatprep.subr.bf16.mxu1 %v3430_v46  ;;  %v4461_v46 = vld [vmem:[#allocation7 + $0x8] ss:$24 sps:$4 sm:$0xff]   ;;  %s5097_s23 = scalar_lea.hbm %s5516_s26, %s3246_s13  ;;  %p3934_p1 = pneg %p3933_p12 }
  0xf0   : > { %1456 = vmatprep.subr.bf16.mxu0 %v4355_v36 }
  0xf2   : > { %854 = vmatpush1.bf16.msra.mxu1 %v3435_v48  ;;  %v4463_v48 = vld [vmem:[#allocation7 + $0x10] ss:$24 sps:$4 sm:$0xff]  }
  0xf3   : > { %1457 = vmatpush1.bf16.msra.mxu0 %v4359_v39  ;;  %855 = vmatprep.subr.bf16.mxu1 %v3436_v50  ;;  %5325 = vst [vmem:[#allocation28_spill] sm:$0xff] %v4463_v48 }
  0xf4   : > { %1458 = vmatprep.subr.bf16.mxu0 %v4362_v40 }
  0xf6   : > { %856 = vmatpush1.bf16.msra.mxu1 %v3441_v52  ;;  %v4467_v52 = vld [vmem:[#allocation7 + $0x3c] ss:$24 sps:$4 sm:$0xff]  }
  0xf7   : > { %1459 = vmatpush1.bf16.msra.mxu0 %v4365_v43  ;;  %857 = vmatprep.subr.bf16.mxu1 %v3442_v54  ;;  %v4469_v54 = vld [vmem:[#allocation7 + $0x44] ss:$24 sps:$4 sm:$0xff]  }
  0xf8   : > { %1460 = vmatprep.subr.bf16.mxu0 %v4367_v44  ;;  %5326 = vst [vmem:[#allocation29_spill] sm:$0xff] %v4469_v54 }
  0xfa   : > { %858 = vmatpush1.bf16.msra.mxu1 %v3447_v56  ;;  %v4475_v56 = vld [vmem:[#allocation7 + $0x38] ss:$24 sps:$4 sm:$0xff]  }
  0xfb   : > { %1461 = vmatpush1.bf16.msra.mxu0 %v4372_v47  ;;  %859 = vmatprep.subr.bf16.mxu1 %v3448_v58  ;;  %v4477_v58 = vld [vmem:[#allocation7 + $0x40] ss:$24 sps:$4 sm:$0xff]  }
  0xfc   : > { %1462 = vmatprep.subr.bf16.mxu0 %v4375_v49  ;;  %5327 = vst [vmem:[#allocation30_spill] sm:$0xff] %v4477_v58 }
  0xfe   : > { %860 = vmatpush1.bf16.msra.mxu1 %v3453_v60  ;;  %v4479_v60 = vld [vmem:[#allocation7 + $0x6c] ss:$24 sps:$4 sm:$0xff]  }
  0xff   : > { %1463 = vmatpush1.bf16.msra.mxu0 %v4377_v51  ;;  %861 = vmatprep.subr.bf16.mxu1 %v3454_v62  ;;  %v4481_v62 = vld [vmem:[#allocation7 + $0x74] ss:$24 sps:$4 sm:$0xff]  }
 0x100   : > { %1464 = vmatprep.subr.bf16.mxu0 %v4379_v53  ;;  %5328 = vst [vmem:[#allocation31_spill] sm:$0xff] %v4481_v62 }
 0x102   : > { %862 = vmatpush1.bf16.msra.mxu1 %v3459_v0  ;;  %v4487_v0 = vld [vmem:[#allocation7 + $0x68] ss:$24 sps:$4 sm:$0xff]  }
 0x103   : > { %1465 = vmatpush1.bf16.msra.mxu0 %v4383_v55  ;;  %863 = vmatprep.subr.bf16.mxu1 %v3460_v11  ;;  %v4489_v11 = vld [vmem:[#allocation7 + $0x70] ss:$24 sps:$4 sm:$0xff]  }
 0x104   : > { %1466 = vmatprep.subr.bf16.mxu0 %v4385_v57  ;;  %5329 = vst [vmem:[#allocation32_spill] sm:$0xff] %v4489_v11 }
 0x106   : > { %864 = vmatpush1.bf16.msra.mxu1 %v3465_v14  ;;  %v4493_v14 = vld [vmem:[#allocation7 + $0x9c] ss:$24 sps:$4 sm:$0xff]  }
 0x107   : > { %1467 = vmatpush1.bf16.msra.mxu0 %v4389_v59  ;;  %865 = vmatprep.subr.bf16.mxu1 %v3466_v15  ;;  %v4495_v15 = vld [vmem:[#allocation7 + $0xa4] ss:$24 sps:$4 sm:$0xff]  }
 0x108   : > { %1468 = vmatprep.subr.bf16.mxu0 %v4391_v61  ;;  %5330 = vst [vmem:[#allocation33_spill] sm:$0xff] %v4495_v15 }
 0x10a   : > { %866 = vmatpush1.bf16.msra.mxu1 %v3471_v18  ;;  %v4499_v18 = vld [vmem:[#allocation7 + $0x98] ss:$24 sps:$4 sm:$0xff]  }
 0x10b   : > { %1469 = vmatpush1.bf16.msra.mxu0 %v4395_v63  ;;  %1493 = vmatprep.subr.bf16.mxu1 %v4442_v19 }
 0x10c   : > { %1470 = vmatprep.subr.bf16.mxu0 %v4397_v1 }
 0x10f   : > { %1471 = vmatpush1.bf16.msra.mxu0 %v4401_v2 }
 0x110   : > { %1472 = vmatprep.subr.bf16.mxu0 %v4403_v3 }
 0x113   : > { %1473 = vmatpush1.bf16.msra.mxu0 %v4407_v4 }
 0x114   : > { %1474 = vmatprep.subr.bf16.mxu0 %v4409_v5 }
 0x117   : > { %1475 = vmatpush1.bf16.msra.mxu0 %v4413_v6 }
 0x118   : > { %1476 = vmatprep.subr.bf16.mxu0 %v4415_v7 }
 0x11b   : > { %1477 = vmatpush1.bf16.msra.mxu0 %v4419_v8 }
 0x11c   : > { %1478 = vmatprep.subr.bf16.mxu0 %v4421_v9 }
 0x11f   : > { %1479 = vmatpush1.bf16.msra.mxu0 %v4425_v10 }
 0x120   : > { %1480 = vmatprep.subr.bf16.mxu0 %v4430_v12 }
 0x123   : > { %1481 = vmatpush1.bf16.msra.mxu0 %v4432_v13 }
 0x124   : > { %1482 = vmatprep.subr.bf16.mxu0 %v4436_v16 }
 0x127   : > { %1483 = vmatpush1.bf16.msra.mxu0 %v4438_v17 }
 0x128   : > { %1534 = vmatprep.subr.bf16.mxu0 %v4444_v20 }
 0x1bd   : > { %v632_v29 = vpop.f32.mrb[0].mxu0 }
 0x1be   : > { %v633_v30 = vadd.f32 %v632_v29, %v511_v26  ;;  %v634_v33 = vpop.f32.mrb[1].mxu0  ;;  %v4507_v26 = vld [vmem:[#allocation7 + $0xd4] ss:$24 sps:$4 sm:$0xff]   ;;  %v4513_v29 = vld [vmem:[#allocation7 + $0xd0] ss:$24 sps:$4 sm:$0xff]  }
 0x1bf   : > { %v635_v34 = vadd.f32 %v634_v33, %v515_v28  ;;  %v636_v37 = vpop.f32.mrb[2].mxu0  ;;  %5332 = vst [vmem:[#allocation35_spill] sm:$0xff] %v4507_v26  ;;  %v4511_v28 = vld [vmem:[#allocation7 + $0xc8] ss:$24 sps:$4 sm:$0xff]   ;;  %5333 = vst [vmem:[#allocation36_spill] sm:$0xff] %v4513_v29 }
 0x1c0   : > { %v639_v38 = vmax.f32 %v633_v30, 0.0  ;;  %v637_v41 = vpop.f32.mrb[3].mxu0  ;;  %v4517_v30 = vld [vmem:[#allocation7 + $0xfc] ss:$24 sps:$4 sm:$0xff]   ;;  %v4525_v37 = vld [vmem:[#allocation7 + $0x100] ss:$24 sps:$4 sm:$0xff]  }
 0x1c1   : > { %v640_v42 = vmax.f32 %v635_v34, 0.0  ;;  %v4519_v33 = vld [vmem:[#allocation7 + $0x104] ss:$24 sps:$4 sm:$0xff]   ;;  %v4523_v34 = vld [vmem:[#allocation7 + $0xf8] ss:$24 sps:$4 sm:$0xff]   ;;  %5335 = vst [vmem:[#allocation38_spill] sm:$0xff] %v4525_v37 }
 0x1c2   : > { %v4465_v50 = vpack.c.bf16 %v639_v38, %v639_v38  ;;  %5334 = vst [vmem:[#allocation37_spill] sm:$0xff] %v4519_v33  ;;  %v4529_v38 = vld [vmem:[#allocation7 + $0x12c] ss:$24 sps:$4 sm:$0xff]  }
 0x1c3   : > { %v642_v45 = vpack.c.bf16 %v640_v42, %v640_v42  ;;  %v4531_v41 = vld [vmem:[#allocation7 + $0x134] ss:$24 sps:$4 sm:$0xff]   ;;  %v4535_v42 = vld [vmem:[#allocation7 + $0x128] ss:$24 sps:$4 sm:$0xff]  }
 0x1c4   : > { %5336 = vst [vmem:[#allocation39_spill] sm:$0xff] %v4531_v41 }
 0x1c5   : > { %867 = vmatprep.mubr.bf16.mxu1 %v642_v45  ;;  %1484 = vmatprep.mubr.bf16.mxu0 %v642_v45 }
 0x1c6   : > { %868 = vmatmul.mubr.bf16.vlgmr.msra.gmra.mrb[0].mxu1 %v4465_v50  ;;  %1485 = vmatmul.mubr.bf16.vlgmr.msra.gmra.mrb[4].mxu0 %v4465_v50 }
 0x1c7   : > { %1494 = vmatpush1.bf16.msra.mxu1 %v4461_v46  ;;  %1535 = vmatpush1.bf16.msra.mxu0 %v4463_v48  ;;  %v4585_v48 = vld [vmem:[#allocation7 + $0x1f0] ss:$24 sps:$4 sm:$0xff]  }
 0x1c8   : > { %1525 = vmatprep.mubr.bf16.mxu1 %v642_v45  ;;  %1566 = vmatprep.mubr.bf16.mxu0 %v642_v45  ;;  %v4537_v45 = vld [vmem:[#allocation7 + $0x130] ss:$24 sps:$4 sm:$0xff]   ;;  %5348 = vst [vmem:[#allocation51_spill] sm:$0xff] %v4585_v48 }
 0x1c9   : > { %1495 = vmatprep.subr.bf16.mxu1 %v4467_v52  ;;  %1536 = vmatprep.subr.bf16.mxu0 %v4469_v54  ;;  %5337 = vst [vmem:[#allocation40_spill] sm:$0xff] %v4537_v45  ;;  %v4579_v54 = vld [vmem:[#allocation7 + $0x1f4] ss:$24 sps:$4 sm:$0xff]  }
 0x1ca   : > { %5346 = vst [vmem:[#allocation49_spill] sm:$0xff] %v4579_v54 }
 0x1cb   : > { %1496 = vmatpush1.bf16.msra.mxu1 %v4475_v56  ;;  %1537 = vmatpush1.bf16.msra.mxu0 %v4477_v58  ;;  %v4573_v58 = vld [vmem:[#allocation7 + $0x1c0] ss:$24 sps:$4 sm:$0xff]  }
 0x1cc   : > { %1497 = vmatprep.subr.bf16.mxu1 %v4479_v60  ;;  %1538 = vmatprep.subr.bf16.mxu0 %v4481_v62  ;;  %v4567_v62 = vld [vmem:[#allocation7 + $0x1c4] ss:$24 sps:$4 sm:$0xff]   ;;  %5344 = vst [vmem:[#allocation47_spill] sm:$0xff] %v4573_v58 }
 0x1cd   : > { %5342 = vst [vmem:[#allocation45_spill] sm:$0xff] %v4567_v62 }
 0x1cf   : > { %1498 = vmatpush1.bf16.msra.mxu1 %v4487_v0  ;;  %1539 = vmatpush1.bf16.msra.mxu0 %v4489_v11  ;;  %v4561_v11 = vld [vmem:[#allocation7 + $0x190] ss:$24 sps:$4 sm:$0xff]  }
 0x1d0   : > { %1499 = vmatprep.subr.bf16.mxu1 %v4493_v14  ;;  %1540 = vmatprep.subr.bf16.mxu0 %v4495_v15  ;;  %v4555_v15 = vld [vmem:[#allocation7 + $0x194] ss:$24 sps:$4 sm:$0xff]   ;;  %5341 = vst [vmem:[#allocation44_spill] sm:$0xff] %v4561_v11 }
 0x1d1   : > { %5340 = vst [vmem:[#allocation43_spill] sm:$0xff] %v4555_v15 }
 0x1d3   : > { %1500 = vmatpush1.bf16.msra.mxu1 %v4499_v18  ;;  %1541 = vmatpush1.bf16.msra.mxu0 %v4501_v21  ;;  %v4549_v21 = vld [vmem:[#allocation7 + $0x160] ss:$24 sps:$4 sm:$0xff]  }
 0x1d4   : > { %1501 = vmatprep.subr.bf16.mxu1 %v4505_v24  ;;  %1542 = vmatprep.subr.bf16.mxu0 %v4507_v26  ;;  %v4543_v26 = vld [vmem:[#allocation7 + $0x164] ss:$24 sps:$4 sm:$0xff]   ;;  %5339 = vst [vmem:[#allocation42_spill] sm:$0xff] %v4549_v21 }
 0x1d5   : > { %5338 = vst [vmem:[#allocation41_spill] sm:$0xff] %v4543_v26 }
 0x1d7   : > { %1502 = vmatpush1.bf16.msra.mxu1 %v4511_v28  ;;  %1543 = vmatpush1.bf16.msra.mxu0 %v4513_v29  ;;  %v4541_v29 = vld [vmem:[#allocation7 + $0x15c] ss:$24 sps:$4 sm:$0xff]  }
 0x1d8   : > { %1503 = vmatprep.subr.bf16.mxu1 %v4517_v30  ;;  %1544 = vmatprep.subr.bf16.mxu0 %v4519_v33  ;;  %v4547_v33 = vld [vmem:[#allocation7 + $0x158] ss:$24 sps:$4 sm:$0xff]  }
 0x1db   : > { %1504 = vmatpush1.bf16.msra.mxu1 %v4523_v34  ;;  %1545 = vmatpush1.bf16.msra.mxu0 %v4525_v37  ;;  %v4553_v37 = vld [vmem:[#allocation7 + $0x18c] ss:$24 sps:$4 sm:$0xff]  }
 0x1dc   : > { %1505 = vmatprep.subr.bf16.mxu1 %v4529_v38  ;;  %1546 = vmatprep.subr.bf16.mxu0 %v4531_v41  ;;  %v4559_v41 = vld [vmem:[#allocation7 + $0x188] ss:$24 sps:$4 sm:$0xff]  }
 0x1df   : > { %1506 = vmatpush1.bf16.msra.mxu1 %v4535_v42  ;;  %1547 = vmatpush1.bf16.msra.mxu0 %v4537_v45  ;;  %v4565_v45 = vld [vmem:[#allocation7 + $0x1bc] ss:$24 sps:$4 sm:$0xff]  }
 0x1e0   : > { %1507 = vmatprep.subr.bf16.mxu1 %v4541_v29  ;;  %1548 = vmatprep.subr.bf16.mxu0 %v4543_v26  ;;  %v4571_v26 = vld [vmem:[#allocation7 + $0x1b8] ss:$24 sps:$4 sm:$0xff]  }
 0x1e1   : > { %5343 = vst [vmem:[#allocation46_spill] sm:$0xff] %v4571_v26 }
 0x1e3   : > { %1508 = vmatpush1.bf16.msra.mxu1 %v4547_v33  ;;  %1549 = vmatpush1.bf16.msra.mxu0 %v4549_v21  ;;  %v4577_v21 = vld [vmem:[#allocation7 + $0x1ec] ss:$24 sps:$4 sm:$0xff]  }
 0x1e4   : > { %1509 = vmatprep.subr.bf16.mxu1 %v4553_v37  ;;  %1550 = vmatprep.subr.bf16.mxu0 %v4555_v15  ;;  %5345 = vst [vmem:[#allocation48_spill] sm:$0xff] %v4577_v21  ;;  %v4583_v15 = vld [vmem:[#allocation7 + $0x1e8] ss:$24 sps:$4 sm:$0xff]  }
 0x1e5   : > { %5347 = vst [vmem:[#allocation50_spill] sm:$0xff] %v4583_v15 }
 0x1e7   : > { %1510 = vmatpush1.bf16.msra.mxu1 %v4559_v41  ;;  %1551 = vmatpush1.bf16.msra.mxu0 %v4561_v11  ;;  %v4589_v11 = vld [vmem:[#allocation7 + $0x21c] ss:$24 sps:$4 sm:$0xff]  }
 0x1e8   : > { %1511 = vmatprep.subr.bf16.mxu1 %v4565_v45  ;;  %1552 = vmatprep.subr.bf16.mxu0 %v4567_v62  ;;  %5349 = vst [vmem:[#allocation52_spill] sm:$0xff] %v4589_v11  ;;  %v4595_v62 = vld [vmem:[#allocation7 + $0x218] ss:$24 sps:$4 sm:$0xff]  }
 0x1e9   : > { %5351 = vst [vmem:[#allocation54_spill] sm:$0xff] %v4595_v62 }
 0x1eb   : > { %1512 = vmatpush1.bf16.msra.mxu1 %v4571_v26  ;;  %1553 = vmatpush1.bf16.msra.mxu0 %v4573_v58  ;;  %v4597_v26 = vld [vmem:[#allocation7 + $0x220] ss:$24 sps:$4 sm:$0xff]   ;;  %v4601_v58 = vld [vmem:[#allocation7 + $0x24c] ss:$24 sps:$4 sm:$0xff]  }
 0x1ec   : > { %1513 = vmatprep.subr.bf16.mxu1 %v4577_v21  ;;  %1554 = vmatprep.subr.bf16.mxu0 %v4579_v54  ;;  %5352 = vst [vmem:[#allocation55_spill] sm:$0xff] %v4597_v26  ;;  %5353 = vst [vmem:[#allocation56_spill] sm:$0xff] %v4601_v58  ;;  %v4603_v21 = vld [vmem:[#allocation7 + $0x254] ss:$24 sps:$4 sm:$0xff]   ;;  %v4607_v54 = vld [vmem:[#allocation7 + $0x248] ss:$24 sps:$4 sm:$0xff]  }
 0x1ed   : > { %5354 = vst [vmem:[#allocation57_spill] sm:$0xff] %v4603_v21  ;;  %5355 = vst [vmem:[#allocation58_spill] sm:$0xff] %v4607_v54 }
 0x1ef   : > { %1514 = vmatpush1.bf16.msra.mxu1 %v4583_v15  ;;  %1555 = vmatpush1.bf16.msra.mxu0 %v4585_v48  ;;  %v4609_v15 = vld [vmem:[#allocation7 + $0x250] ss:$24 sps:$4 sm:$0xff]   ;;  %v4613_v48 = vld [vmem:[#allocation7 + $0x27c] ss:$24 sps:$4 sm:$0xff]  }
 0x1f0   : > { %1515 = vmatprep.subr.bf16.mxu1 %v4589_v11  ;;  %1556 = vmatprep.subr.bf16.mxu0 %v4591_v22  ;;  %5356 = vst [vmem:[#allocation59_spill] sm:$0xff] %v4609_v15  ;;  %5357 = vst [vmem:[#allocation60_spill] sm:$0xff] %v4613_v48  ;;  %v4615_v11 = vld [vmem:[#allocation7 + $0x284] ss:$24 sps:$4 sm:$0xff]   ;;  %v4619_v22 = vld [vmem:[#allocation7 + $0x278] ss:$24 sps:$4 sm:$0xff]  }
 0x1f1   : > { %5358 = vst [vmem:[#allocation61_spill] sm:$0xff] %v4615_v11  ;;  %5359 = vst [vmem:[#allocation62_spill] sm:$0xff] %v4619_v22 }
 0x1f3   : > { %1516 = vmatpush1.bf16.msra.mxu1 %v4595_v62  ;;  %1557 = vmatpush1.bf16.msra.mxu0 %v4597_v26  ;;  %v4621_v62 = vld [vmem:[#allocation7 + $0x280] ss:$24 sps:$4 sm:$0xff]   ;;  %v4625_v26 = vld [vmem:[#allocation7 + $0x2ac] ss:$24 sps:$4 sm:$0xff]  }
 0x1f4   : > { %1517 = vmatprep.subr.bf16.mxu1 %v4601_v58  ;;  %1558 = vmatprep.subr.bf16.mxu0 %v4603_v21  ;;  %5360 = vst [vmem:[#allocation63_spill] sm:$0xff] %v4621_v62  ;;  %5361 = vst [vmem:[#allocation64_spill] sm:$0xff] %v4625_v26  ;;  %v4627_v58 = vld [vmem:[#allocation7 + $0x2b4] ss:$24 sps:$4 sm:$0xff]   ;;  %v4631_v21 = vld [vmem:[#allocation7 + $0x2a8] ss:$24 sps:$4 sm:$0xff]  }
 0x1f5   : > { %5362 = vst [vmem:[#allocation65_spill] sm:$0xff] %v4627_v58  ;;  %5363 = vst [vmem:[#allocation66_spill] sm:$0xff] %v4631_v21 }
 0x1f7   : > { %1518 = vmatpush1.bf16.msra.mxu1 %v4607_v54  ;;  %1559 = vmatpush1.bf16.msra.mxu0 %v4609_v15  ;;  %v4633_v54 = vld [vmem:[#allocation7 + $0x2b0] ss:$24 sps:$4 sm:$0xff]   ;;  %v4637_v15 = vld [vmem:[#allocation7 + $0x2dc] ss:$24 sps:$4 sm:$0xff]  }
 0x1f8   : > { %1519 = vmatprep.subr.bf16.mxu1 %v4613_v48  ;;  %1560 = vmatprep.subr.bf16.mxu0 %v4615_v11  ;;  %5364 = vst [vmem:[#allocation67_spill] sm:$0xff] %v4633_v54  ;;  %5365 = vst [vmem:[#allocation68_spill] sm:$0xff] %v4637_v15  ;;  %v4639_v48 = vld [vmem:[#allocation7 + $0x2e4] ss:$24 sps:$4 sm:$0xff]   ;;  %v4643_v11 = vld [vmem:[#allocation7 + $0x2d8] ss:$24 sps:$4 sm:$0xff]  }
 0x1f9   : > { %5366 = vst [vmem:[#allocation69_spill] sm:$0xff] %v4639_v48  ;;  %5367 = vst [vmem:[#allocation70_spill] sm:$0xff] %v4643_v11 }
 0x1fb   : > { %1520 = vmatpush1.bf16.msra.mxu1 %v4619_v22  ;;  %1561 = vmatpush1.bf16.msra.mxu0 %v4621_v62  ;;  %v4645_v22 = vld [vmem:[#allocation7 + $0x2e0] ss:$24 sps:$4 sm:$0xff]  }
 0x1fc   : > { %1521 = vmatprep.subr.bf16.mxu1 %v4625_v26  ;;  %1562 = vmatprep.subr.bf16.mxu0 %v4627_v58  ;;  %5368 = vst [vmem:[#allocation71_spill] sm:$0xff] %v4645_v22  ;;  %v485_v58 = vld [vmem:[%s5145_s4] sm:$0x3] }
 0x1ff   : > { %1522 = vmatpush1.bf16.msra.mxu1 %v4631_v21  ;;  %1563 = vmatpush1.bf16.msra.mxu0 %v4633_v54 }
 0x200   : > { %1523 = vmatprep.subr.bf16.mxu1 %v4637_v15  ;;  %1564 = vmatprep.subr.bf16.mxu0 %v4639_v48 }
 0x203   : > { %1524 = vmatpush1.bf16.msra.mxu1 %v4643_v11  ;;  %1565 = vmatpush1.bf16.msra.mxu0 %v4645_v22 }
 0x204   : > { %1881 = vmatprep.subr.bf16.mxu0 %v4346_v27  ;;  %v4665_v27 = vld [vmem:[#allocation8] ss:$8 sps:$4 sm:$0xff]  }
 0x206   : > { %1526 = vmatmul.mubr.bf16.vlgmr.msra.gmra.mrb[4].mxu1 %v4465_v50  ;;  %1567 = vmatmul.mubr.bf16.vlgmr.msra.gmra.mrb[8].mxu0 %v4465_v50  ;;  %v4770_v50 = vld [vmem:[#allocation8 + $0xe4] ss:$8 sps:$4 sm:$0xff]  }
 0x207   : > { %1882 = vmatpush1.bf16.msra.mxu0 %v4348_v31  ;;  %v4667_v31 = vld [vmem:[#allocation8 + $0x4] ss:$8 sps:$4 sm:$0xff]   ;;  %5387 = vst [vmem:[#allocation90_spill] sm:$0xff] %v4770_v50 }
 0x208   : > { %1883 = vmatprep.subr.bf16.mxu0 %v4350_v32  ;;  %5369 = vst [vmem:[#allocation72_spill] sm:$0xff] %v4667_v31  ;;  %v4670_v32 = vld [vmem:[#allocation8 + $0x14] ss:$8 sps:$4 sm:$0xff]   ;;  %1807 = vmatprep.subr.bf16.mxu1 %v4667_v31 }
 0x209   : > { %1808 = vmatpush1.bf16.msra.mxu1 %v4665_v27 }
 0x20a   : > { %1809 = vmatprep.subr.bf16.mxu1 %v4670_v32 }
 0x20b   : > { %1884 = vmatpush1.bf16.msra.mxu0 %v4353_v35  ;;  %v4674_v35 = vld [vmem:[#allocation8 + $0x10] ss:$8 sps:$4 sm:$0xff]  }
 0x20c   : > { %1885 = vmatprep.subr.bf16.mxu0 %v4355_v36  ;;  %v4678_v36 = vld [vmem:[#allocation8 + $0x24] ss:$8 sps:$4 sm:$0xff]  }
 0x20d   : > { %1810 = vmatpush1.bf16.msra.mxu1 %v4674_v35 }
 0x20e   : > { %1811 = vmatprep.subr.bf16.mxu1 %v4678_v36 }
 0x20f   : > { %1886 = vmatpush1.bf16.msra.mxu0 %v4359_v39  ;;  %v4682_v39 = vld [vmem:[#allocation8 + $0x20] ss:$8 sps:$4 sm:$0xff]  }
 0x210   : > { %1887 = vmatprep.subr.bf16.mxu0 %v4362_v40  ;;  %v4686_v40 = vld [vmem:[#allocation8 + $0x34] ss:$8 sps:$4 sm:$0xff]  }
 0x211   : > { %1812 = vmatpush1.bf16.msra.mxu1 %v4682_v39 }
 0x212   : > { %1813 = vmatprep.subr.bf16.mxu1 %v4686_v40 }
 0x213   : > { %1888 = vmatpush1.bf16.msra.mxu0 %v4365_v43  ;;  %v4690_v43 = vld [vmem:[#allocation8 + $0x30] ss:$8 sps:$4 sm:$0xff]  }
 0x214   : > { %1889 = vmatprep.subr.bf16.mxu0 %v4367_v44  ;;  %v4694_v44 = vld [vmem:[#allocation8 + $0x44] ss:$8 sps:$4 sm:$0xff]  }
 0x215   : > { %1814 = vmatpush1.bf16.msra.mxu1 %v4690_v43 }
 0x216   : > { %1815 = vmatprep.subr.bf16.mxu1 %v4694_v44 }
 0x217   : > { %1890 = vmatpush1.bf16.msra.mxu0 %v4372_v47  ;;  %v4698_v47 = vld [vmem:[#allocation8 + $0x40] ss:$8 sps:$4 sm:$0xff]  }
 0x218   : > { %1891 = vmatprep.subr.bf16.mxu0 %v4375_v49  ;;  %v4702_v49 = vld [vmem:[#allocation8 + $0x54] ss:$8 sps:$4 sm:$0xff]  }
 0x219   : > { %1816 = vmatpush1.bf16.msra.mxu1 %v4698_v47 }
 0x21a   : > { %1817 = vmatprep.subr.bf16.mxu1 %v4702_v49 }
 0x21b   : > { %1892 = vmatpush1.bf16.msra.mxu0 %v4377_v51  ;;  %v4706_v51 = vld [vmem:[#allocation8 + $0x50] ss:$8 sps:$4 sm:$0xff]  }
 0x21c   : > { %1893 = vmatprep.subr.bf16.mxu0 %v4379_v53  ;;  %5370 = vst [vmem:[#allocation73_spill] sm:$0xff] %v4706_v51  ;;  %v4710_v53 = vld [vmem:[#allocation8 + $0x64] ss:$8 sps:$4 sm:$0xff]  }
 0x21d   : > { %5371 = vst [vmem:[#allocation74_spill] sm:$0xff] %v4710_v53  ;;  %1818 = vmatpush1.bf16.msra.mxu1 %v4706_v51 }
 0x21e   : > { %1819 = vmatprep.subr.bf16.mxu1 %v4710_v53 }
 0x21f   : > { %1894 = vmatpush1.bf16.msra.mxu0 %v4383_v55  ;;  %v4714_v55 = vld [vmem:[#allocation8 + $0x60] ss:$8 sps:$4 sm:$0xff]  }
 0x220   : > { %1895 = vmatprep.subr.bf16.mxu0 %v4385_v57  ;;  %5372 = vst [vmem:[#allocation75_spill] sm:$0xff] %v4714_v55  ;;  %v4718_v57 = vld [vmem:[#allocation8 + $0x74] ss:$8 sps:$4 sm:$0xff]  }
 0x221   : > { %5373 = vst [vmem:[#allocation76_spill] sm:$0xff] %v4718_v57  ;;  %1820 = vmatpush1.bf16.msra.mxu1 %v4714_v55 }
 0x222   : > { %1821 = vmatprep.subr.bf16.mxu1 %v4718_v57 }
 0x223   : > { %1896 = vmatpush1.bf16.msra.mxu0 %v4389_v59  ;;  %v4722_v59 = vld [vmem:[#allocation8 + $0x70] ss:$8 sps:$4 sm:$0xff]  }
 0x224   : > { %1897 = vmatprep.subr.bf16.mxu0 %v4391_v61  ;;  %5374 = vst [vmem:[#allocation77_spill] sm:$0xff] %v4722_v59  ;;  %v4726_v61 = vld [vmem:[#allocation8 + $0x84] ss:$8 sps:$4 sm:$0xff]  }
 0x225   : > { %5375 = vst [vmem:[#allocation78_spill] sm:$0xff] %v4726_v61  ;;  %1822 = vmatpush1.bf16.msra.mxu1 %v4722_v59 }
 0x226   : > { %1823 = vmatprep.subr.bf16.mxu1 %v4726_v61 }
 0x227   : > { %1898 = vmatpush1.bf16.msra.mxu0 %v4395_v63  ;;  %v4730_v63 = vld [vmem:[#allocation8 + $0x80] ss:$8 sps:$4 sm:$0xff]  }
 0x228   : > { %1899 = vmatprep.subr.bf16.mxu0 %v4397_v1  ;;  %5376 = vst [vmem:[#allocation79_spill] sm:$0xff] %v4730_v63  ;;  %v4734_v1 = vld [vmem:[#allocation8 + $0x94] ss:$8 sps:$4 sm:$0xff]  }
 0x229   : > { %5377 = vst [vmem:[#allocation80_spill] sm:$0xff] %v4734_v1  ;;  %1824 = vmatpush1.bf16.msra.mxu1 %v4730_v63 }
 0x22a   : > { %1825 = vmatprep.subr.bf16.mxu1 %v4734_v1 }
 0x22b   : > { %1900 = vmatpush1.bf16.msra.mxu0 %v4401_v2  ;;  %v4738_v2 = vld [vmem:[#allocation8 + $0x90] ss:$8 sps:$4 sm:$0xff]  }
 0x22c   : > { %1901 = vmatprep.subr.bf16.mxu0 %v4403_v3  ;;  %5378 = vst [vmem:[#allocation81_spill] sm:$0xff] %v4738_v2  ;;  %v4742_v3 = vld [vmem:[#allocation8 + $0xa4] ss:$8 sps:$4 sm:$0xff]  }
 0x22d   : > { %5379 = vst [vmem:[#allocation82_spill] sm:$0xff] %v4742_v3  ;;  %1826 = vmatpush1.bf16.msra.mxu1 %v4738_v2 }
 0x22e   : > { %1827 = vmatprep.subr.bf16.mxu1 %v4742_v3 }
 0x22f   : > { %1902 = vmatpush1.bf16.msra.mxu0 %v4407_v4  ;;  %v4746_v4 = vld [vmem:[#allocation8 + $0xa0] ss:$8 sps:$4 sm:$0xff]  }
 0x230   : > { %1903 = vmatprep.subr.bf16.mxu0 %v4409_v5  ;;  %5380 = vst [vmem:[#allocation83_spill] sm:$0xff] %v4746_v4  ;;  %v4750_v5 = vld [vmem:[#allocation8 + $0xb4] ss:$8 sps:$4 sm:$0xff]  }
 0x231   : > { %5381 = vst [vmem:[#allocation84_spill] sm:$0xff] %v4750_v5  ;;  %1828 = vmatpush1.bf16.msra.mxu1 %v4746_v4 }
 0x232   : > { %1829 = vmatprep.subr.bf16.mxu1 %v4750_v5 }
 0x233   : > { %1904 = vmatpush1.bf16.msra.mxu0 %v4413_v6  ;;  %v4754_v6 = vld [vmem:[#allocation8 + $0xb0] ss:$8 sps:$4 sm:$0xff]  }
 0x234   : > { %1905 = vmatprep.subr.bf16.mxu0 %v4415_v7  ;;  %5382 = vst [vmem:[#allocation85_spill] sm:$0xff] %v4754_v6  ;;  %v4757_v7 = vld [vmem:[#allocation8 + $0xc4] ss:$8 sps:$4 sm:$0xff]  }
 0x235   : > { %5383 = vst [vmem:[#allocation86_spill] sm:$0xff] %v4757_v7  ;;  %1830 = vmatpush1.bf16.msra.mxu1 %v4754_v6 }
 0x236   : > { %1831 = vmatprep.subr.bf16.mxu1 %v4757_v7 }
 0x237   : > { %1906 = vmatpush1.bf16.msra.mxu0 %v4419_v8  ;;  %v4760_v8 = vld [vmem:[#allocation8 + $0xc0] ss:$8 sps:$4 sm:$0xff]  }
 0x238   : > { %1907 = vmatprep.subr.bf16.mxu0 %v4421_v9  ;;  %5384 = vst [vmem:[#allocation87_spill] sm:$0xff] %v4760_v8  ;;  %v4764_v9 = vld [vmem:[#allocation8 + $0xd4] ss:$8 sps:$4 sm:$0xff]  }
 0x239   : > { %1832 = vmatpush1.bf16.msra.mxu1 %v4760_v8  ;;  %5385 = vst [vmem:[#allocation88_spill] sm:$0xff] %v4764_v9 }
 0x23a   : > { %1833 = vmatprep.subr.bf16.mxu1 %v4764_v9 }
 0x23b   : > { %1908 = vmatpush1.bf16.msra.mxu0 %v4425_v10  ;;  %v4766_v10 = vld [vmem:[#allocation8 + $0xd0] ss:$8 sps:$4 sm:$0xff]  }
 0x23c   : > { %1909 = vmatprep.subr.bf16.mxu0 %v4430_v12  ;;  %5386 = vst [vmem:[#allocation89_spill] sm:$0xff] %v4766_v10 }
 0x23d   : > { %1834 = vmatpush1.bf16.msra.mxu1 %v4766_v10 }
 0x23e   : > { %1835 = vmatprep.subr.bf16.mxu1 %v4770_v50 }
 0x23f   : > { %1910 = vmatpush1.bf16.msra.mxu0 %v4432_v13 }
 0x240   : > { %1911 = vmatprep.subr.bf16.mxu0 %v4436_v16  ;;  %v4778_v16 = vld [vmem:[#allocation8 + $0xf4] ss:$8 sps:$4 sm:$0xff]  }
 0x241   : > { %5390 = vst [vmem:[#allocation93_spill] sm:$0xff] %v4778_v16 }
 0x243   : > { %1912 = vmatpush1.bf16.msra.mxu0 %v4438_v17  ;;  %v4776_v17 = vld [vmem:[#allocation8 + $0xf0] ss:$8 sps:$4 sm:$0xff]  }
 0x244   : > { %1963 = vmatprep.subr.bf16.mxu0 %v4444_v20  ;;  %v4772_v20 = vld [vmem:[#allocation8 + $0xe0] ss:$8 sps:$4 sm:$0xff]   ;;  %5389 = vst [vmem:[#allocation92_spill] sm:$0xff] %v4776_v17 }
 0x245   : > { %5388 = vst [vmem:[#allocation91_spill] sm:$0xff] %v4772_v20  ;;  %1836 = vmatpush1.bf16.msra.mxu1 %v4772_v20 }
 0x246   : > { %1837 = vmatprep.subr.bf16.mxu1 %v4778_v16 }
 0x249   : > { %1838 = vmatpush1.bf16.msra.mxu1 %v4776_v17 }
 0x24a   : > { %1922 = vmatprep.subr.bf16.mxu1 %v4442_v19  ;;  %v4791_v19 = vrot.slane %v485_v58, %v4451_v23 }
 0x299   : > { %v4783_v13 = vpop.f32.mrb[0].mxu1  ;;  %v1486_v12 = vpop.f32.mrb[4].mxu0 }
 0x29a   : > { %5391 = vst [vmem:[#allocation94_spill] sm:$0xff] %v4783_v13  ;;  %v4785_v22 = vpop.f32.mrb[1].mxu1  ;;  %v1488_v48 = vpop.f32.mrb[5].mxu0 }
 0x29b   : > { %5392 = vst [vmem:[#allocation95_spill] sm:$0xff] %v4785_v22  ;;  %v873_v54 = vpop.f32.mrb[2].mxu1  ;;  %v1490_v50 = vpop.f32.mrb[6].mxu0 }
 0x29c   : > { %v874_v10 = vpop.f32.mrb[3].mxu1  ;;  %v1491_v20 = vpop.f32.mrb[7].mxu0 }
 0x29d   : > { %v4797_v20 = vrot.slane %v485_v58, %v4457_v25 }
 0x2d9   : > { %v1527_v62 = vpop.f32.mrb[4].mxu1  ;;  %v1568_v16 = vpop.f32.mrb[8].mxu0 }
 0x2da   : > { %v1575_v9 = vrot.slane %v1527_v62, 7  ;;  %v1577_v17 = vrot.slane %v1527_v62, 1  ;;  %v4794_v8 = vadd.f32 %v1568_v16, %v4783_v13  ;;  %v1529_v7 = vpop.f32.mrb[5].mxu1  ;;  %v1570_v6 = vpop.f32.mrb[9].mxu0 }
 0x2db   : > { %v1576_v54 = vrot.slane %v1529_v7, 7  ;;  %v1578_v50 = vrot.slane %v1529_v7, 1  ;;  %v4800_v10 = vadd.f32 %v1570_v6, %v4785_v22  ;;  %v1531_v5 = vpop.f32.mrb[6].mxu1  ;;  %v1572_v4 = vpop.f32.mrb[10].mxu0 }
 0x2dc   : > { %v1579_v3 = vadd.f32 %v1575_v9, %v1486_v12  ;;  %v1596_v62 = vadd.f32 %v1577_v17, %v1486_v12  ;;  %v1532_v2 = vpop.f32.mrb[7].mxu1  ;;  %v1573_v1 = vpop.f32.mrb[11].mxu0  ;;  %v5393_v12 = vld [vmem:[#allocation46_spill] sm:$0xff] }
 0x2dd   : > { %v1580_v63 = vadd.f32 %v1576_v54, %v1488_v48  ;;  %v1597_v61 = vadd.f32 %v1578_v50, %v1488_v48  ;;  %v5395_v17 = vld [vmem:[#allocation50_spill] sm:$0xff]  ;;  %v486_v1 = vld [vmem:[%s5147_s6] sm:$0x3] }
 0x2de   : > { %v1592_v16 = vadd.f32 %v4791_v19, %v1579_v3  ;;  %v1598_v13 = vadd.f32 %v1596_v62, %v4791_v19  ;;  %v5397_v48 = vld [vmem:[#allocation54_spill] sm:$0xff]  ;;  %v4842_v2 = vrot.slane %v486_v1, %v4451_v23  ;;  %v4845_v3 = vrot.slane %v486_v1, %v4457_v25  ;;  %v5404_v54 = vld [vmem:[#allocation25_spill] sm:$0xff] }
 0x2df   : > { %v1593_v7 = vadd.f32 %v4797_v20, %v1580_v63  ;;  %v1599_v58 = vadd.f32 %v1597_v61, %v4797_v20  ;;  %v5400_v61 = vld [vmem:[#allocation60_spill] sm:$0xff]  ;;  %v5401_v63 = vld [vmem:[#allocation62_spill] sm:$0xff]  ;;  %vm478_vm0 = vcmp.ge.s32.totalorder %v5404_v54, 1  ;;  %vm481_vm1 = vcmp.le.s32.totalorder %v5404_v54, 6 }
 0x2e0   : > { %v1594_v59 = vmax.f32 %v1592_v16, 0.0  ;;  %v1600_v57 = vmax.f32 %v1598_v13, 0.0  ;;  %v5394_v13 = vld [vmem:[#allocation48_spill] sm:$0xff]  ;;  %5402 = vst [vmem:[#allocation46_spill] sm:$0xff] %v4842_v2  ;;  %v487_v16 = vld [vmem:[%s5405_s25] sm:$0x3] }
 0x2e1   : > { %v1595_v6 = vmax.f32 %v1593_v7, 0.0  ;;  %v1601_v22 = vmax.f32 %v1599_v58, 0.0  ;;  %5403 = vst [vmem:[#allocation48_spill] sm:$0xff] %v4845_v3  ;;  %v4024_v1 = vmov 0.0   ;;  %v4861_v54 = vrot.slane %v487_v16, %v4451_v23  ;;  %s3935_s25 = sshll.u32 %s4025_s8, 4  ;;  %s3936_s25 = int_to_ptr.vmem [resolvable:$false] %s3935_s25 }
 0x2e2   : > { %v1602_v5 = vpack.c.bf16 %v1600_v57, %v1594_v59  ;;  %v5398_v57 = vld [vmem:[#allocation56_spill] sm:$0xff]  ;;  %v5399_v59 = vld [vmem:[#allocation58_spill] sm:$0xff]  ;;  %s3937_s14 = scalar_lea.vmem %s3936_s25, 1024  ;;  %p3938_p13 = scmp.lt.s32.totalorder %s5099_s27, %s3936_s25 }
 0x2e3   : > { %v1603_v4 = vpack.c.bf16 %v1601_v22, %v1595_v6  ;;  %v5396_v22 = vld [vmem:[#allocation52_spill] sm:$0xff]  ;;  %p3939_p0 = scmp.lt.s32.totalorder %s3937_s14, %s3931_s15 }
 0x2e5   : > { %1839 = vmatprep.mubr.bf16.mxu1 %v1603_v4  ;;  %p3940_p2 = por %p3939_p0, %p3938_p13 }
 0x2e6   : > { %1840 = vmatmul.mubr.bf16.vlgmr.msra.gmra.mrb[8].mxu1 %v1602_v5 }
 0x2e7   : > { %1923 = vmatpush1.bf16.msra.mxu1 %v4461_v46  ;;  %p3941_p3 = pnand %p3940_p2, %p3934_p1 }
 0x2e8   : > { %1924 = vmatprep.subr.bf16.mxu1 %v4467_v52 }
 0x2eb   : > { %1925 = vmatpush1.bf16.msra.mxu1 %v4475_v56 }
 0x2ec   : > { %1926 = vmatprep.subr.bf16.mxu1 %v4479_v60 }
 0x2ef   : > { %1927 = vmatpush1.bf16.msra.mxu1 %v4487_v0 }
 0x2f0   : > { %1928 = vmatprep.subr.bf16.mxu1 %v4493_v14 }
 0x2f3   : > { %1929 = vmatpush1.bf16.msra.mxu1 %v4499_v18 }
 0x2f4   : > { %1930 = vmatprep.subr.bf16.mxu1 %v4505_v24 }
 0x2f7   : > { %1931 = vmatpush1.bf16.msra.mxu1 %v4511_v28 }
 0x2f8   : > { %1932 = vmatprep.subr.bf16.mxu1 %v4517_v30 }
 0x2fb   : > { %1933 = vmatpush1.bf16.msra.mxu1 %v4523_v34 }
 0x2fc   : > { %1934 = vmatprep.subr.bf16.mxu1 %v4529_v38 }
 0x2ff   : > { %1935 = vmatpush1.bf16.msra.mxu1 %v4535_v42 }
 0x300   : > { %1936 = vmatprep.subr.bf16.mxu1 %v4541_v29 }
 0x303   : > { %1937 = vmatpush1.bf16.msra.mxu1 %v4547_v33 }
 0x304   : > { %1938 = vmatprep.subr.bf16.mxu1 %v4553_v37 }
 0x307   : > { %1939 = vmatpush1.bf16.msra.mxu1 %v4559_v41 }
 0x308   : > { %1940 = vmatprep.subr.bf16.mxu1 %v4565_v45 }
 0x30b   : > { %1941 = vmatpush1.bf16.msra.mxu1 %v5393_v12 }
 0x30c   : > { %1942 = vmatprep.subr.bf16.mxu1 %v5394_v13 }
 0x30f   : > { %1943 = vmatpush1.bf16.msra.mxu1 %v5395_v17 }
 0x310   : > { %1944 = vmatprep.subr.bf16.mxu1 %v5396_v22 }
 0x313   : > { %1945 = vmatpush1.bf16.msra.mxu1 %v5397_v48 }
 0x314   : > { %1946 = vmatprep.subr.bf16.mxu1 %v5398_v57 }
 0x317   : > { %1947 = vmatpush1.bf16.msra.mxu1 %v5399_v59 }
 0x318   : > { %1948 = vmatprep.subr.bf16.mxu1 %v5400_v61 }
 0x31b   : > { %1949 = vmatpush1.bf16.msra.mxu1 %v5401_v63 }
 0x31c   : > { %1950 = vmatprep.subr.bf16.mxu1 %v4625_v26  ;;  %v4864_v26 = vrot.slane %v487_v16, %v4457_v25 }
 0x31e   : > { %v1874_v23 = vadd.f32 %v4864_v26, %v4800_v10  ;;  %v5411_v10 = vld [vmem:[#allocation33_spill] sm:$0xff] }
 0x31f   : > { %1951 = vmatpush1.bf16.msra.mxu1 %v4631_v21 }
 0x320   : > { %1952 = vmatprep.subr.bf16.mxu1 %v4637_v15  ;;  %v4857_v15 = vsel %vm481_vm1, 1.0, %v4024_v1 }
 0x323   : > { %1953 = vmatpush1.bf16.msra.mxu1 %v4643_v11 }
 0x324   : > { %2022 = vmatprep.subr.bf16.mxu1 %v4667_v31  ;;  %v4855_v31 = vsel %vm478_vm0, 1.0, %v4024_v1  ;;  %v1873_v1 = vadd.f32 %v4861_v54, %v4794_v8  ;;  %v5409_v8 = vld [vmem:[#allocation31_spill] sm:$0xff] }
 0x3b9   : > { %v1841_v9 = vpop.f32.mrb[8].mxu1 }
 0x3ba   : > { %v1842_v50 = vadd.f32 %v1841_v9, %v4842_v2  ;;  %v1843_v62 = vpop.f32.mrb[9].mxu1 }
 0x3bb   : > { %v1844_v7 = vadd.f32 %v1843_v62, %v4845_v3  ;;  %v1845_v58 = vpop.f32.mrb[10].mxu1 }
 0x3bc   : > { %v1850_v6 = vmax.f32 %v1842_v50, 0.0  ;;  %v1846_v5 = vadd.f32 %v1845_v58, %v4842_v2  ;;  %v1847_v4 = vpop.f32.mrb[11].mxu1 }
 0x3bd   : > { %v1851_v11 = vmax.f32 %v1844_v7, 0.0  ;;  %v1848_v9 = vadd.f32 %v1847_v4, %v4845_v3 }
 0x3be   : > { %v1852_v21 = vmax.f32 %v1846_v5, 0.0  ;;  %v1854_v50 = vmul.f32 %v4855_v31, %v1850_v6 }
 0x3bf   : > { %v1853_v62 = vmax.f32 %v1848_v9, 0.0  ;;  %v1855_v2 = vmul.f32 %v4855_v31, %v1851_v11  ;;  %v5406_v11 = vld [vmem:[#allocation28_spill] sm:$0xff] }
 0x3c0   : > { %v1856_v58 = vmul.f32 %v4857_v15, %v1852_v21  ;;  %v5407_v21 = vld [vmem:[#allocation29_spill] sm:$0xff] }
 0x3c1   : > { %v1857_v7 = vmul.f32 %v4857_v15, %v1853_v62  ;;  %v5415_v62 = vld [vmem:[#allocation37_spill] sm:$0xff] }
 0x3c2   : > { %v1858_v4 = vadd.f32 %v1856_v58, %v1854_v50  ;;  %v5416_v50 = vld [vmem:[#allocation38_spill] sm:$0xff]  ;;  %v5417_v58 = vld [vmem:[#allocation39_spill] sm:$0xff] }
 0x3c3   : > { %v1859_v5 = vadd.f32 %v1857_v7, %v1855_v2  ;;  %v5413_v2 = vld [vmem:[#allocation35_spill] sm:$0xff]  ;;  %v5418_v7 = vld [vmem:[#allocation40_spill] sm:$0xff] }
 0x3c4   : > { %v1875_v3 = vadd.f32 %v1873_v1, %v1858_v4  ;;  %v5419_v1 = vld [vmem:[#allocation41_spill] sm:$0xff]  ;;  %v5420_v4 = vld [vmem:[#allocation76_spill] sm:$0xff] }
 0x3c5   : > { %v1876_v16 = vadd.f32 %v1874_v23, %v1859_v5  ;;  %v5408_v23 = vld [vmem:[#allocation30_spill] sm:$0xff] }
 0x3c6   : > { %v1877_v25 = vmax.f32 %v1875_v3, 0.0  ;;  %v5414_v3 = vld [vmem:[#allocation36_spill] sm:$0xff]  ;;  %v5421_v5 = vld [vmem:[#allocation42_spill] sm:$0xff] }
 0x3c7   : > { %v1878_v9 = vmax.f32 %v1876_v16, 0.0  ;;  %v5422_v16 = vld [vmem:[#allocation43_spill] sm:$0xff] }
 0x3c8   : > { %v4874_v6 = vpack.c.bf16 %v1877_v25, %v1877_v25  ;;  %v5410_v25 = vld [vmem:[#allocation32_spill] sm:$0xff] }
 0x3c9   : > { %v1880_v63 = vpack.c.bf16 %v1878_v9, %v1878_v9  ;;  %v5423_v9 = vld [vmem:[#allocation77_spill] sm:$0xff] }
 0x3cb   : > { %1913 = vmatprep.mubr.bf16.mxu0 %v1880_v63  ;;  %1954 = vmatprep.mubr.bf16.mxu1 %v1880_v63 }
 0x3cc   : > { %1914 = vmatmul.mubr.bf16.vlgmr.msra.gmra.mrb[12].mxu0 %v4874_v6  ;;  %1955 = vmatmul.mubr.bf16.vlgmr.msra.gmra.mrb[12].mxu1 %v4874_v6 }
 0x3cd   : > { %1964 = vmatpush1.bf16.msra.mxu0 %v5406_v11  ;;  %1995 = vmatprep.mubr.bf16.mxu0 %v1880_v63  ;;  %v5412_v63 = vld [vmem:[#allocation34_spill] sm:$0xff] }
 0x3ce   : > { %1965 = vmatprep.subr.bf16.mxu0 %v5407_v21  ;;  %2023 = vmatpush1.bf16.msra.mxu1 %v4665_v27  ;;  %v5424_v11 = vld [vmem:[#allocation78_spill] sm:$0xff]  ;;  %v5425_v21 = vld [vmem:[#allocation44_spill] sm:$0xff] }
 0x3cf   : > { %2024 = vmatprep.subr.bf16.mxu1 %v4670_v32 }
 0x3d1   : > { %1966 = vmatpush1.bf16.msra.mxu0 %v5408_v23  ;;  %v5426_v23 = vld [vmem:[#allocation45_spill] sm:$0xff] }
 0x3d2   : > { %1967 = vmatprep.subr.bf16.mxu0 %v5409_v8  ;;  %2025 = vmatpush1.bf16.msra.mxu1 %v4674_v35  ;;  %v5427_v8 = vld [vmem:[#allocation79_spill] sm:$0xff] }
 0x3d3   : > { %2026 = vmatprep.subr.bf16.mxu1 %v4678_v36 }
 0x3d5   : > { %1968 = vmatpush1.bf16.msra.mxu0 %v5410_v25  ;;  %v5428_v25 = vld [vmem:[#allocation80_spill] sm:$0xff] }
 0x3d6   : > { %1969 = vmatprep.subr.bf16.mxu0 %v5411_v10  ;;  %2027 = vmatpush1.bf16.msra.mxu1 %v4682_v39  ;;  %v5429_v10 = vld [vmem:[#allocation47_spill] sm:$0xff] }
 0x3d7   : > { %2028 = vmatprep.subr.bf16.mxu1 %v4686_v40 }
 0x3d9   : > { %1970 = vmatpush1.bf16.msra.mxu0 %v5412_v63  ;;  %v5430_v63 = vld [vmem:[#allocation49_spill] sm:$0xff] }
 0x3da   : > { %1971 = vmatprep.subr.bf16.mxu0 %v5413_v2  ;;  %2029 = vmatpush1.bf16.msra.mxu1 %v4690_v43  ;;  %v5431_v2 = vld [vmem:[#allocation81_spill] sm:$0xff] }
 0x3db   : > { %2030 = vmatprep.subr.bf16.mxu1 %v4694_v44 }
 0x3dd   : > { %1972 = vmatpush1.bf16.msra.mxu0 %v5414_v3  ;;  %v5432_v3 = vld [vmem:[#allocation82_spill] sm:$0xff] }
 0x3de   : > { %1973 = vmatprep.subr.bf16.mxu0 %v5415_v62  ;;  %2031 = vmatpush1.bf16.msra.mxu1 %v4698_v47  ;;  %v5433_v62 = vld [vmem:[#allocation51_spill] sm:$0xff] }
 0x3df   : > { %2032 = vmatprep.subr.bf16.mxu1 %v4702_v49 }
 0x3e1   : > { %1974 = vmatpush1.bf16.msra.mxu0 %v5416_v50  ;;  %v5434_v50 = vld [vmem:[#allocation53_spill] sm:$0xff] }
 0x3e2   : > { %1975 = vmatprep.subr.bf16.mxu0 %v5417_v58  ;;  %2033 = vmatpush1.bf16.msra.mxu1 %v4706_v51 }
 0x3e3   : > { %2034 = vmatprep.subr.bf16.mxu1 %v4710_v53 }
 0x3e5   : > { %1976 = vmatpush1.bf16.msra.mxu0 %v5418_v7 }
 0x3e6   : > { %1977 = vmatprep.subr.bf16.mxu0 %v5419_v1  ;;  %2035 = vmatpush1.bf16.msra.mxu1 %v4714_v55 }
 0x3e7   : > { %2036 = vmatprep.subr.bf16.mxu1 %v5420_v4 }
 0x3e9   : > { %1978 = vmatpush1.bf16.msra.mxu0 %v5421_v5 }
 0x3ea   : > { %1979 = vmatprep.subr.bf16.mxu0 %v5422_v16  ;;  %2037 = vmatpush1.bf16.msra.mxu1 %v5423_v9 }
 0x3eb   : > { %2038 = vmatprep.subr.bf16.mxu1 %v5424_v11  ;;  %v5435_v11 = vld [vmem:[#allocation83_spill] sm:$0xff] }
 0x3ed   : > { %1980 = vmatpush1.bf16.msra.mxu0 %v5425_v21  ;;  %v5436_v21 = vld [vmem:[#allocation84_spill] sm:$0xff] }
 0x3ee   : > { %1981 = vmatprep.subr.bf16.mxu0 %v5426_v23  ;;  %2039 = vmatpush1.bf16.msra.mxu1 %v5427_v8  ;;  %v5437_v23 = vld [vmem:[#allocation55_spill] sm:$0xff]  ;;  %v5438_v8 = vld [vmem:[#allocation57_spill] sm:$0xff] }
 0x3ef   : > { %2040 = vmatprep.subr.bf16.mxu1 %v5428_v25  ;;  %v5439_v25 = vld [vmem:[#allocation85_spill] sm:$0xff] }
 0x3f1   : > { %1982 = vmatpush1.bf16.msra.mxu0 %v5429_v10  ;;  %v5440_v10 = vld [vmem:[#allocation86_spill] sm:$0xff] }
 0x3f2   : > { %1983 = vmatprep.subr.bf16.mxu0 %v5430_v63  ;;  %2041 = vmatpush1.bf16.msra.mxu1 %v5431_v2  ;;  %v5441_v63 = vld [vmem:[#allocation59_spill] sm:$0xff]  ;;  %v5442_v2 = vld [vmem:[#allocation61_spill] sm:$0xff] }
 0x3f3   : > { %2042 = vmatprep.subr.bf16.mxu1 %v5432_v3  ;;  %v5443_v3 = vld [vmem:[#allocation87_spill] sm:$0xff] }
 0x3f5   : > { %1984 = vmatpush1.bf16.msra.mxu0 %v5433_v62  ;;  %v5444_v62 = vld [vmem:[#allocation88_spill] sm:$0xff] }
 0x3f6   : > { %1985 = vmatprep.subr.bf16.mxu0 %v5434_v50  ;;  %2043 = vmatpush1.bf16.msra.mxu1 %v5435_v11  ;;  %v5445_v50 = vld [vmem:[#allocation63_spill] sm:$0xff]  ;;  %v5446_v11 = vld [vmem:[#allocation65_spill] sm:$0xff] }
 0x3f7   : > { %2044 = vmatprep.subr.bf16.mxu1 %v5436_v21  ;;  %v5447_v21 = vld [vmem:[#allocation89_spill] sm:$0xff] }
 0x3f9   : > { %1986 = vmatpush1.bf16.msra.mxu0 %v5437_v23  ;;  %v5448_v23 = vld [vmem:[#allocation90_spill] sm:$0xff] }
 0x3fa   : > { %1987 = vmatprep.subr.bf16.mxu0 %v5438_v8  ;;  %2045 = vmatpush1.bf16.msra.mxu1 %v5439_v25  ;;  %v5449_v8 = vld [vmem:[#allocation67_spill] sm:$0xff]  ;;  %v5450_v25 = vld [vmem:[#allocation69_spill] sm:$0xff] }
 0x3fb   : > { %2046 = vmatprep.subr.bf16.mxu1 %v5440_v10  ;;  %v5451_v10 = vld [vmem:[#allocation91_spill] sm:$0xff] }
 0x3fd   : > { %1988 = vmatpush1.bf16.msra.mxu0 %v5441_v63  ;;  %v5452_v63 = vld [vmem:[#allocation93_spill] sm:$0xff] }
 0x3fe   : > { %1989 = vmatprep.subr.bf16.mxu0 %v5442_v2  ;;  %2047 = vmatpush1.bf16.msra.mxu1 %v5443_v3  ;;  %v5453_v2 = vld [vmem:[#allocation71_spill] sm:$0xff]  ;;  %v5454_v3 = vld [vmem:[#allocation92_spill] sm:$0xff] }
 0x3ff   : > { %2048 = vmatprep.subr.bf16.mxu1 %v5444_v62  ;;  %v3722_v62 = vld [vmem:[#allocation7 + $0x4] ss:$24 sps:$4 sm:$0xff]  }
 0x401   : > { %1990 = vmatpush1.bf16.msra.mxu0 %v5445_v50  ;;  %v5455_v50 = vld [vmem:[#allocation23_spill] sm:$0xff] }
 0x402   : > { %1991 = vmatprep.subr.bf16.mxu0 %v5446_v11  ;;  %2049 = vmatpush1.bf16.msra.mxu1 %v5447_v21  ;;  %v3723_v21 = vld [vmem:[#allocation7] ss:$24 sps:$4 sm:$0xff]  }
 0x403   : > { %2050 = vmatprep.subr.bf16.mxu1 %v5448_v23  ;;  %v3724_v23 = vld [vmem:[#allocation7 + $0x34] ss:$24 sps:$4 sm:$0xff]  }
 0x405   : > { %1992 = vmatpush1.bf16.msra.mxu0 %v5449_v8  ;;  %v3725_v8 = vld [vmem:[#allocation7 + $0x30] ss:$24 sps:$4 sm:$0xff]  }
 0x406   : > { %1993 = vmatprep.subr.bf16.mxu0 %v5450_v25  ;;  %2051 = vmatpush1.bf16.msra.mxu1 %v5451_v10  ;;  %v3726_v25 = vld [vmem:[#allocation7 + $0x64] ss:$24 sps:$4 sm:$0xff]   ;;  %v3727_v10 = vld [vmem:[#allocation7 + $0x60] ss:$24 sps:$4 sm:$0xff]  }
 0x407   : > { %2052 = vmatprep.subr.bf16.mxu1 %v5452_v63  ;;  %v3728_v63 = vld [vmem:[#allocation7 + $0x94] ss:$24 sps:$4 sm:$0xff]  }
 0x409   : > { %1994 = vmatpush1.bf16.msra.mxu0 %v5453_v2  ;;  %v3729_v2 = vld [vmem:[#allocation7 + $0x90] ss:$24 sps:$4 sm:$0xff]  }
 0x40a   : > { %2053 = vmatpush1.bf16.msra.mxu1 %v5454_v3  ;;  %2085 = vmatprep.subr.bf16.mxu0 %v3722_v62  ;;  %v3730_v3 = vld [vmem:[#allocation7 + $0xc4] ss:$24 sps:$4 sm:$0xff]   ;;  %v3731_v62 = vld [vmem:[#allocation7 + $0xc0] ss:$24 sps:$4 sm:$0xff]  }
 0x40b   : > { %2126 = vmatprep.subr.bf16.mxu1 %v5455_v50  ;;  %v3732_v50 = vld [vmem:[#allocation7 + $0xf4] ss:$24 sps:$4 sm:$0xff]  }
 0x40c   : > { %1996 = vmatmul.mubr.bf16.vlgmr.msra.gmra.mrb[16].mxu0 %v4874_v6  ;;  %v3733_v6 = vld [vmem:[#allocation7 + $0xf0] ss:$24 sps:$4 sm:$0xff]  }
 0x40d   : > { %2086 = vmatpush1.bf16.msra.mxu0 %v3723_v21  ;;  %v3734_v21 = vld [vmem:[#allocation7 + $0x124] ss:$24 sps:$4 sm:$0xff]  }
 0x40e   : > { %2087 = vmatprep.subr.bf16.mxu0 %v3724_v23  ;;  %v3735_v23 = vld [vmem:[#allocation7 + $0x120] ss:$24 sps:$4 sm:$0xff]  }
 0x411   : > { %2088 = vmatpush1.bf16.msra.mxu0 %v3725_v8  ;;  %v3736_v8 = vld [vmem:[#allocation7 + $0x154] ss:$24 sps:$4 sm:$0xff]  }
 0x412   : > { %2089 = vmatprep.subr.bf16.mxu0 %v3726_v25  ;;  %v3737_v25 = vld [vmem:[#allocation7 + $0x150] ss:$24 sps:$4 sm:$0xff]  }
 0x415   : > { %2090 = vmatpush1.bf16.msra.mxu0 %v3727_v10  ;;  %v3738_v10 = vld [vmem:[#allocation7 + $0x184] ss:$24 sps:$4 sm:$0xff]  }
 0x416   : > { %2091 = vmatprep.subr.bf16.mxu0 %v3728_v63  ;;  %v3739_v63 = vld [vmem:[#allocation7 + $0x180] ss:$24 sps:$4 sm:$0xff]  }
 0x419   : > { %2092 = vmatpush1.bf16.msra.mxu0 %v3729_v2  ;;  %v3740_v2 = vld [vmem:[#allocation7 + $0x1b4] ss:$24 sps:$4 sm:$0xff]  }
 0x41a   : > { %2093 = vmatprep.subr.bf16.mxu0 %v3730_v3  ;;  %v3741_v3 = vld [vmem:[#allocation7 + $0x1b0] ss:$24 sps:$4 sm:$0xff]  }
 0x41d   : > { %2094 = vmatpush1.bf16.msra.mxu0 %v3731_v62  ;;  %v3742_v62 = vld [vmem:[#allocation7 + $0x1e4] ss:$24 sps:$4 sm:$0xff]  }
 0x41e   : > { %2095 = vmatprep.subr.bf16.mxu0 %v3732_v50  ;;  %v3743_v50 = vld [vmem:[#allocation7 + $0x1e0] ss:$24 sps:$4 sm:$0xff]  }
 0x421   : > { %2096 = vmatpush1.bf16.msra.mxu0 %v3733_v6  ;;  %v3744_v6 = vld [vmem:[#allocation7 + $0x214] ss:$24 sps:$4 sm:$0xff]  }
 0x422   : > { %2097 = vmatprep.subr.bf16.mxu0 %v3734_v21  ;;  %v3745_v21 = vld [vmem:[#allocation7 + $0x210] ss:$24 sps:$4 sm:$0xff]  }
 0x425   : > { %2098 = vmatpush1.bf16.msra.mxu0 %v3735_v23  ;;  %v3746_v23 = vld [vmem:[#allocation7 + $0x244] ss:$24 sps:$4 sm:$0xff]  }
 0x426   : > { %2099 = vmatprep.subr.bf16.mxu0 %v3736_v8  ;;  %v3747_v8 = vld [vmem:[#allocation7 + $0x240] ss:$24 sps:$4 sm:$0xff]  }
 0x429   : > { %2100 = vmatpush1.bf16.msra.mxu0 %v3737_v25  ;;  %v3748_v25 = vld [vmem:[#allocation7 + $0x274] ss:$24 sps:$4 sm:$0xff]  }
 0x42a   : > { %2101 = vmatprep.subr.bf16.mxu0 %v3738_v10  ;;  %v3749_v10 = vld [vmem:[#allocation7 + $0x270] ss:$24 sps:$4 sm:$0xff]  }
 0x42d   : > { %2102 = vmatpush1.bf16.msra.mxu0 %v3739_v63  ;;  %v5456_v63 = vld [vmem:[#allocation19_spill] sm:$0xff] }
 0x42e   : > { %2103 = vmatprep.subr.bf16.mxu0 %v3740_v2  ;;  %v5457_v2 = vld [vmem:[#allocation20_spill] sm:$0xff] }
 0x431   : > { %2104 = vmatpush1.bf16.msra.mxu0 %v3741_v3  ;;  %v5458_v3 = vld [vmem:[#allocation21_spill] sm:$0xff] }
 0x432   : > { %2105 = vmatprep.subr.bf16.mxu0 %v3742_v62  ;;  %v5459_v62 = vld [vmem:[#allocation22_spill] sm:$0xff] }
 0x435   : > { %2106 = vmatpush1.bf16.msra.mxu0 %v3743_v50  ;;  %v5460_v50 = vld [vmem:[#allocation24_spill] sm:$0xff] }
 0x436   : > { %2107 = vmatprep.subr.bf16.mxu0 %v3744_v6 }
 0x439   : > { %2108 = vmatpush1.bf16.msra.mxu0 %v3745_v21 }
 0x43a   : > { %2109 = vmatprep.subr.bf16.mxu0 %v3746_v23 }
 0x43d   : > { %2110 = vmatpush1.bf16.msra.mxu0 %v3747_v8 }
 0x43e   : > { %2111 = vmatprep.subr.bf16.mxu0 %v3748_v25 }
 0x441   : > { %2112 = vmatpush1.bf16.msra.mxu0 %v3749_v10 }
 0x442   : > { %2113 = vmatprep.subr.bf16.mxu0 %v5456_v63 }
 0x445   : > { %2114 = vmatpush1.bf16.msra.mxu0 %v5457_v2 }
 0x446   : > { %2115 = vmatprep.subr.bf16.mxu0 %v5458_v3 }
 0x449   : > { %2116 = vmatpush1.bf16.msra.mxu0 %v5459_v62 }
 0x44a   : > { %2167 = vmatprep.subr.bf16.mxu0 %v5460_v50 }
 0x49f   : > { %v1915_v6 = vpop.f32.mrb[12].mxu0  ;;  %v1956_v21 = vpop.f32.mrb[12].mxu1 }
 0x4a0   : > { %v2004_v11 = vrot.slane %v1956_v21, 7  ;;  %v2006_v23 = vrot.slane %v1956_v21, 1  ;;  %v1917_v9 = vpop.f32.mrb[13].mxu0  ;;  %v1958_v8 = vpop.f32.mrb[13].mxu1 }
 0x4a1   : > { %v2005_v16 = vrot.slane %v1958_v8, 7  ;;  %v2007_v25 = vrot.slane %v1958_v8, 1  ;;  %v1919_v5 = vpop.f32.mrb[14].mxu0  ;;  %v1960_v10 = vpop.f32.mrb[14].mxu1 }
 0x4a2   : > { %v2008_v4 = vadd.f32 %v2004_v11, %v1915_v6  ;;  %v2014_v63 = vadd.f32 %v2006_v23, %v1915_v6  ;;  %v1920_v55 = vpop.f32.mrb[15].mxu0  ;;  %v1961_v2 = vpop.f32.mrb[15].mxu1 }
 0x4a3   : > { %v2009_v1 = vadd.f32 %v2005_v16, %v1917_v9  ;;  %v2015_v3 = vadd.f32 %v2007_v25, %v1917_v9 }
 0x4a4   : > { %v2010_v62 = vadd.f32 %v2008_v4, %v4791_v19  ;;  %v2016_v50 = vadd.f32 %v2014_v63, %v4791_v19 }
 0x4a5   : > { %v2011_v7 = vadd.f32 %v2009_v1, %v4797_v20  ;;  %v2017_v21 = vadd.f32 %v2015_v3, %v4797_v20 }
 0x4a6   : > { %v2012_v53 = vmax.f32 %v2010_v62, 0.0  ;;  %v2018_v51 = vmax.f32 %v2016_v50, 0.0  ;;  %v3750_v62 = vld [vmem:[#allocation7 + $0x10] ss:$24 sps:$4 sm:$0xff]   ;;  %v3751_v50 = vld [vmem:[#allocation7 + $0x44] ss:$24 sps:$4 sm:$0xff]  }
 0x4a7   : > { %v2013_v58 = vmax.f32 %v2011_v7, 0.0  ;;  %v2019_v8 = vmax.f32 %v2017_v21, 0.0  ;;  %v3752_v21 = vld [vmem:[#allocation7 + $0x40] ss:$24 sps:$4 sm:$0xff]  }
 0x4a8   : > { %v2020_v5 = vpack.c.bf16 %v2018_v51, %v2012_v53  ;;  %v5470_v51 = vld [vmem:[#allocation48_spill] sm:$0xff] }
 0x4a9   : > { %v2021_v10 = vpack.c.bf16 %v2019_v8, %v2013_v58  ;;  %v3753_v8 = vld [vmem:[#allocation7 + $0x74] ss:$24 sps:$4 sm:$0xff]  }
 0x4ab   : > { %2054 = vmatprep.mubr.bf16.mxu1 %v2021_v10  ;;  %v3755_v10 = vld [vmem:[#allocation7 + $0xa4] ss:$24 sps:$4 sm:$0xff]  }
 0x4ac   : > { %2055 = vmatmul.mubr.bf16.vlgmr.msra.gmra.mrb[16].mxu1 %v2020_v5  ;;  %v3754_v5 = vld [vmem:[#allocation7 + $0x70] ss:$24 sps:$4 sm:$0xff]  }
 0x4ad   : > { %2127 = vmatpush1.bf16.msra.mxu1 %v4461_v46 }
 0x4ae   : > { %2128 = vmatprep.subr.bf16.mxu1 %v4467_v52  ;;  %v5461_v52 = vld [vmem:[#allocation94_spill] sm:$0xff] }
 0x4b1   : > { %2129 = vmatpush1.bf16.msra.mxu1 %v4475_v56 }
 0x4b2   : > { %2130 = vmatprep.subr.bf16.mxu1 %v4479_v60 }
 0x4b5   : > { %2131 = vmatpush1.bf16.msra.mxu1 %v4487_v0  ;;  %v5462_v0 = vld [vmem:[#allocation95_spill] sm:$0xff] }
 0x4b6   : > { %2132 = vmatprep.subr.bf16.mxu1 %v4493_v14 }
 0x4b9   : > { %2133 = vmatpush1.bf16.msra.mxu1 %v4499_v18 }
 0x4ba   : > { %2134 = vmatprep.subr.bf16.mxu1 %v4505_v24  ;;  %v5463_v24 = vld [vmem:[#allocation62_spill] sm:$0xff] }
 0x4bd   : > { %2135 = vmatpush1.bf16.msra.mxu1 %v4511_v28 }
 0x4be   : > { %2136 = vmatprep.subr.bf16.mxu1 %v4517_v30  ;;  %v5465_v30 = vld [vmem:[#allocation66_spill] sm:$0xff] }
 0x4c1   : > { %2137 = vmatpush1.bf16.msra.mxu1 %v4523_v34  ;;  %v5467_v34 = vld [vmem:[#allocation70_spill] sm:$0xff] }
 0x4c2   : > { %2138 = vmatprep.subr.bf16.mxu1 %v4529_v38 }
 0x4c5   : > { %2139 = vmatpush1.bf16.msra.mxu1 %v4535_v42 }
 0x4c6   : > { %2140 = vmatprep.subr.bf16.mxu1 %v4541_v29  ;;  %v5464_v29 = vld [vmem:[#allocation64_spill] sm:$0xff] }
 0x4c9   : > { %2141 = vmatpush1.bf16.msra.mxu1 %v4547_v33  ;;  %v5466_v33 = vld [vmem:[#allocation68_spill] sm:$0xff] }
 0x4ca   : > { %2142 = vmatprep.subr.bf16.mxu1 %v4553_v37  ;;  %v5468_v37 = vld [vmem:[#allocation72_spill] sm:$0xff] }
 0x4cd   : > { %2143 = vmatpush1.bf16.msra.mxu1 %v4559_v41  ;;  %v5469_v41 = vld [vmem:[#allocation46_spill] sm:$0xff] }
 0x4ce   : > { %2144 = vmatprep.subr.bf16.mxu1 %v4565_v45 }
 0x4d1   : > { %2145 = vmatpush1.bf16.msra.mxu1 %v5393_v12 }
 0x4d2   : > { %2146 = vmatprep.subr.bf16.mxu1 %v5394_v13 }
 0x4d5   : > { %2147 = vmatpush1.bf16.msra.mxu1 %v5395_v17 }
 0x4d6   : > { %2148 = vmatprep.subr.bf16.mxu1 %v5396_v22 }
 0x4d9   : > { %2149 = vmatpush1.bf16.msra.mxu1 %v5397_v48 }
 0x4da   : > { %2150 = vmatprep.subr.bf16.mxu1 %v5398_v57 }
 0x4dd   : > { %2151 = vmatpush1.bf16.msra.mxu1 %v5399_v59 }
 0x4de   : > { %2152 = vmatprep.subr.bf16.mxu1 %v5400_v61 }
 0x4df   : > { %v1997_v46 = vpop.f32.mrb[16].mxu0 }
 0x4e0   : > { %v2075_v56 = vadd.f32 %v1997_v46, %v5461_v52  ;;  %v1999_v60 = vpop.f32.mrb[17].mxu0  ;;  %v3756_v46 = vld [vmem:[#allocation7 + $0xa0] ss:$24 sps:$4 sm:$0xff]  }
 0x4e1   : > { %v2076_v14 = vadd.f32 %v1999_v60, %v5462_v0  ;;  %v2001_v18 = vpop.f32.mrb[18].mxu0  ;;  %2153 = vmatpush1.bf16.msra.mxu1 %v5463_v24  ;;  %v5474_v60 = vld [vmem:[#allocation40_spill] sm:$0xff]  ;;  %v5481_v24 = vld [vmem:[#allocation78_spill] sm:$0xff] }
 0x4e2   : > { %v2002_v28 = vpop.f32.mrb[19].mxu0  ;;  %2154 = vmatprep.subr.bf16.mxu1 %v5464_v29  ;;  %v2077_v4 = vadd.f32 %v2075_v56, %v4861_v54  ;;  %v5473_v56 = vld [vmem:[#allocation74_spill] sm:$0xff]  ;;  %v5483_v29 = vld [vmem:[#allocation45_spill] sm:$0xff] }
 0x4e3   : > { %v2078_v9 = vadd.f32 %v2076_v14, %v4864_v26  ;;  %v5477_v14 = vld [vmem:[#allocation76_spill] sm:$0xff]  ;;  %v5478_v18 = vld [vmem:[#allocation42_spill] sm:$0xff] }
 0x4e4   : > { %v5482_v28 = vld [vmem:[#allocation44_spill] sm:$0xff] }
 0x4e5   : > { %2155 = vmatpush1.bf16.msra.mxu1 %v5465_v30  ;;  %v5484_v30 = vld [vmem:[#allocation79_spill] sm:$0xff] }
 0x4e6   : > { %2156 = vmatprep.subr.bf16.mxu1 %v5466_v33  ;;  %v5485_v33 = vld [vmem:[#allocation80_spill] sm:$0xff] }
 0x4e9   : > { %2157 = vmatpush1.bf16.msra.mxu1 %v5467_v34  ;;  %v5486_v34 = vld [vmem:[#allocation47_spill] sm:$0xff] }
 0x4ea   : > { %2226 = vmatprep.subr.bf16.mxu1 %v5468_v37  ;;  %v5487_v37 = vld [vmem:[#allocation49_spill] sm:$0xff] }
 0x57f   : > { %v2056_v38 = vpop.f32.mrb[16].mxu1 }
 0x580   : > { %v2057_v42 = vadd.f32 %v2056_v38, %v5469_v41  ;;  %v2058_v45 = vpop.f32.mrb[17].mxu1  ;;  %v5488_v38 = vld [vmem:[#allocation81_spill] sm:$0xff] }
 0x581   : > { %v2059_v53 = vadd.f32 %v2058_v45, %v5470_v51  ;;  %v2060_v55 = vpop.f32.mrb[18].mxu1  ;;  %v5490_v45 = vld [vmem:[#allocation51_spill] sm:$0xff] }
 0x582   : > { %v2065_v12 = vmax.f32 %v2057_v42, 0.0  ;;  %v2061_v13 = vadd.f32 %v2060_v55, %v5469_v41  ;;  %v2062_v17 = vpop.f32.mrb[19].mxu1  ;;  %v5489_v42 = vld [vmem:[#allocation82_spill] sm:$0xff]  ;;  %v5492_v55 = vld [vmem:[#allocation83_spill] sm:$0xff] }
 0x583   : > { %v2066_v22 = vmax.f32 %v2059_v53, 0.0  ;;  %v2063_v48 = vadd.f32 %v2062_v17, %v5470_v51  ;;  %v5491_v53 = vld [vmem:[#allocation53_spill] sm:$0xff] }
 0x584   : > { %v2067_v57 = vmax.f32 %v2061_v13, 0.0  ;;  %v2069_v61 = vmul.f32 %v4855_v31, %v2065_v12  ;;  %v5493_v12 = vld [vmem:[#allocation84_spill] sm:$0xff]  ;;  %v5494_v13 = vld [vmem:[#allocation55_spill] sm:$0xff]  ;;  %v5495_v17 = vld [vmem:[#allocation57_spill] sm:$0xff] }
 0x585   : > { %v2068_v59 = vmax.f32 %v2063_v48, 0.0  ;;  %v2070_v7 = vmul.f32 %v4855_v31, %v2066_v22  ;;  %v5496_v22 = vld [vmem:[#allocation85_spill] sm:$0xff]  ;;  %v5497_v48 = vld [vmem:[#allocation86_spill] sm:$0xff] }
 0x586   : > { %v2071_v58 = vmul.f32 %v4857_v15, %v2067_v57  ;;  %v5498_v57 = vld [vmem:[#allocation59_spill] sm:$0xff] }
 0x587   : > { %v2072_v1 = vmul.f32 %v4857_v15, %v2068_v59  ;;  %v5499_v59 = vld [vmem:[#allocation61_spill] sm:$0xff] }
 0x588   : > { %v2073_v16 = vadd.f32 %v2071_v58, %v2069_v61  ;;  %v5500_v61 = vld [vmem:[#allocation87_spill] sm:$0xff]  ;;  %v5501_v58 = vld [vmem:[#allocation88_spill] sm:$0xff] }
 0x589   : > { %v2074_v11 = vadd.f32 %v2072_v1, %v2070_v7  ;;  %v5502_v7 = vld [vmem:[#allocation63_spill] sm:$0xff]  ;;  %v5503_v1 = vld [vmem:[#allocation65_spill] sm:$0xff] }
 0x58a   : > { %v2079_v6 = vadd.f32 %v2077_v4, %v2073_v16  ;;  %v5504_v4 = vld [vmem:[#allocation89_spill] sm:$0xff]  ;;  %v5505_v16 = vld [vmem:[#allocation90_spill] sm:$0xff] }
 0x58b   : > { %v2080_v23 = vadd.f32 %v2078_v9, %v2074_v11  ;;  %v5506_v9 = vld [vmem:[#allocation67_spill] sm:$0xff]  ;;  %v5507_v11 = vld [vmem:[#allocation69_spill] sm:$0xff] }
 0x58c   : > { %v2081_v25 = vmax.f32 %v2079_v6, 0.0  ;;  %v5508_v6 = vld [vmem:[#allocation91_spill] sm:$0xff] }
 0x58d   : > { %v2082_v63 = vmax.f32 %v2080_v23, 0.0  ;;  %v5509_v23 = vld [vmem:[#allocation93_spill] sm:$0xff] }
 0x58e   : > { %v4995_v3 = vpack.c.bf16 %v2081_v25, %v2081_v25  ;;  %v5510_v25 = vld [vmem:[#allocation71_spill] sm:$0xff] }
 0x58f   : > { %v2084_v2 = vpack.c.bf16 %v2082_v63, %v2082_v63  ;;  %v5511_v63 = vld [vmem:[#allocation92_spill] sm:$0xff] }
 0x591   : > { %2117 = vmatprep.mubr.bf16.mxu0 %v2084_v2  ;;  %2158 = vmatprep.mubr.bf16.mxu1 %v2084_v2 }
 0x592   : > { %2118 = vmatmul.mubr.bf16.vlgmr.msra.gmra.mrb[20].mxu0 %v4995_v3  ;;  %2159 = vmatmul.mubr.bf16.vlgmr.msra.gmra.mrb[20].mxu1 %v4995_v3 }
 0x593   : > { %2168 = vmatpush1.bf16.msra.mxu0 %v3750_v62  ;;  %2199 = vmatprep.mubr.bf16.mxu0 %v2084_v2  ;;  %v3616_v2 = vld [vmem:[#allocation11] ss:$16 sps:$4 sm:$0xff]   ;;  %v3618_v62 = vld [vmem:[#allocation11 + $0x4] ss:$16 sps:$4 sm:$0xff]  }
 0x594   : > { %2169 = vmatprep.subr.bf16.mxu0 %v3751_v50  ;;  %2227 = vmatpush1.bf16.msra.mxu1 %v4665_v27  ;;  %v3757_v27 = vld [vmem:[#allocation7 + $0xd4] ss:$24 sps:$4 sm:$0xff]  }
 0x595   : > { %2228 = vmatprep.subr.bf16.mxu1 %v4670_v32  ;;  %v3758_v32 = vld [vmem:[#allocation7 + $0xd0] ss:$24 sps:$4 sm:$0xff]   ;;  %v3621_v50 = vld [vmem:[#allocation11 + $0xc] ss:$16 sps:$4 sm:$0xff]  }
 0x597   : > { %2170 = vmatpush1.bf16.msra.mxu0 %v3752_v21  ;;  %v3624_v21 = vld [vmem:[#allocation11 + $0x24] ss:$16 sps:$4 sm:$0xff]  }
 0x598   : > { %2171 = vmatprep.subr.bf16.mxu0 %v3753_v8  ;;  %2229 = vmatpush1.bf16.msra.mxu1 %v4674_v35  ;;  %v3759_v35 = vld [vmem:[#allocation7 + $0x104] ss:$24 sps:$4 sm:$0xff]   ;;  %v3622_v8 = vld [vmem:[#allocation11 + $0x20] ss:$16 sps:$4 sm:$0xff]  }
 0x599   : > { %2230 = vmatprep.subr.bf16.mxu1 %v4678_v36  ;;  %v3760_v36 = vld [vmem:[#allocation7 + $0x100] ss:$24 sps:$4 sm:$0xff]  }
 0x59b   : > { %2172 = vmatpush1.bf16.msra.mxu0 %v3754_v5  ;;  %v3630_v5 = vld [vmem:[#allocation11 + $0x44] ss:$16 sps:$4 sm:$0xff]  }
 0x59c   : > { %2173 = vmatprep.subr.bf16.mxu0 %v3755_v10  ;;  %2231 = vmatpush1.bf16.msra.mxu1 %v4682_v39  ;;  %v5471_v39 = vld [vmem:[#allocation39_spill] sm:$0xff] }
 0x59d   : > { %2232 = vmatprep.subr.bf16.mxu1 %v4686_v40  ;;  %v5472_v40 = vld [vmem:[#allocation73_spill] sm:$0xff] }
 0x59e   : > { %v3628_v10 = vld [vmem:[#allocation11 + $0x40] ss:$16 sps:$4 sm:$0xff]  }
 0x59f   : > { %2174 = vmatpush1.bf16.msra.mxu0 %v3756_v46  ;;  %v3636_v46 = vld [vmem:[#allocation11 + $0x64] ss:$16 sps:$4 sm:$0xff]  }
 0x5a0   : > { %2175 = vmatprep.subr.bf16.mxu0 %v3757_v27  ;;  %2233 = vmatpush1.bf16.msra.mxu1 %v4690_v43  ;;  %v5475_v43 = vld [vmem:[#allocation41_spill] sm:$0xff] }
 0x5a1   : > { %2234 = vmatprep.subr.bf16.mxu1 %v4694_v44  ;;  %v5476_v44 = vld [vmem:[#allocation75_spill] sm:$0xff] }
 0x5a2   : > { %v3634_v27 = vld [vmem:[#allocation11 + $0x60] ss:$16 sps:$4 sm:$0xff]  }
 0x5a3   : > { %2176 = vmatpush1.bf16.msra.mxu0 %v3758_v32  ;;  %v3642_v32 = vld [vmem:[#allocation11 + $0x84] ss:$16 sps:$4 sm:$0xff]  }
 0x5a4   : > { %2177 = vmatprep.subr.bf16.mxu0 %v3759_v35  ;;  %2235 = vmatpush1.bf16.msra.mxu1 %v4698_v47  ;;  %v5479_v47 = vld [vmem:[#allocation43_spill] sm:$0xff] }
 0x5a5   : > { %2236 = vmatprep.subr.bf16.mxu1 %v4702_v49  ;;  %v5480_v49 = vld [vmem:[#allocation77_spill] sm:$0xff] }
 0x5a6   : > { %v3648_v35 = vld [vmem:[#allocation11 + $0xa4] ss:$16 sps:$4 sm:$0xff]  }
 0x5a7   : > { %2178 = vmatpush1.bf16.msra.mxu0 %v3760_v36  ;;  %v3646_v36 = vld [vmem:[#allocation11 + $0xa0] ss:$16 sps:$4 sm:$0xff]  }
 0x5a8   : > { %2179 = vmatprep.subr.bf16.mxu0 %v5471_v39  ;;  %2237 = vmatpush1.bf16.msra.mxu1 %v5472_v40  ;;  %v3654_v39 = vld [vmem:[#allocation11 + $0xc4] ss:$16 sps:$4 sm:$0xff]   ;;  %v3652_v40 = vld [vmem:[#allocation11 + $0xc0] ss:$16 sps:$4 sm:$0xff]  }
 0x5a9   : > { %2238 = vmatprep.subr.bf16.mxu1 %v5473_v56  ;;  %v3660_v56 = vld [vmem:[#allocation11 + $0xe4] ss:$16 sps:$4 sm:$0xff]  }
 0x5ab   : > { %2180 = vmatpush1.bf16.msra.mxu0 %v5474_v60  ;;  %v3658_v60 = vld [vmem:[#allocation11 + $0xe0] ss:$16 sps:$4 sm:$0xff]  }
 0x5ac   : > { %2181 = vmatprep.subr.bf16.mxu0 %v5475_v43  ;;  %2239 = vmatpush1.bf16.msra.mxu1 %v5476_v44 }
 0x5ad   : > { %2240 = vmatprep.subr.bf16.mxu1 %v5477_v14 }
 0x5af   : > { %2182 = vmatpush1.bf16.msra.mxu0 %v5478_v18 }
 0x5b0   : > { %2183 = vmatprep.subr.bf16.mxu0 %v5479_v47  ;;  %2241 = vmatpush1.bf16.msra.mxu1 %v5480_v49 }
 0x5b1   : > { %2242 = vmatprep.subr.bf16.mxu1 %v5481_v24 }
 0x5b3   : > { %2184 = vmatpush1.bf16.msra.mxu0 %v5482_v28 }
 0x5b4   : > { %2185 = vmatprep.subr.bf16.mxu0 %v5483_v29  ;;  %2243 = vmatpush1.bf16.msra.mxu1 %v5484_v30 }
 0x5b5   : > { %2244 = vmatprep.subr.bf16.mxu1 %v5485_v33 }
 0x5b7   : > { %2186 = vmatpush1.bf16.msra.mxu0 %v5486_v34 }
 0x5b8   : > { %2187 = vmatprep.subr.bf16.mxu0 %v5487_v37  ;;  %2245 = vmatpush1.bf16.msra.mxu1 %v5488_v38 }
 0x5b9   : > { %2246 = vmatprep.subr.bf16.mxu1 %v5489_v42 }
 0x5bb   : > { %2188 = vmatpush1.bf16.msra.mxu0 %v5490_v45 }
 0x5bc   : > { %2189 = vmatprep.subr.bf16.mxu0 %v5491_v53  ;;  %2247 = vmatpush1.bf16.msra.mxu1 %v5492_v55 }
 0x5bd   : > { %2248 = vmatprep.subr.bf16.mxu1 %v5493_v12 }
 0x5bf   : > { %2190 = vmatpush1.bf16.msra.mxu0 %v5494_v13 }
 0x5c0   : > { %2191 = vmatprep.subr.bf16.mxu0 %v5495_v17  ;;  %2249 = vmatpush1.bf16.msra.mxu1 %v5496_v22 }
 0x5c1   : > { %2250 = vmatprep.subr.bf16.mxu1 %v5497_v48 }
 0x5c3   : > { %2192 = vmatpush1.bf16.msra.mxu0 %v5498_v57 }
 0x5c4   : > { %2193 = vmatprep.subr.bf16.mxu0 %v5499_v59  ;;  %2251 = vmatpush1.bf16.msra.mxu1 %v5500_v61 }
 0x5c5   : > { %2252 = vmatprep.subr.bf16.mxu1 %v5501_v58  ;;  %v3619_v58 = vld [vmem:[#allocation11 + $0x8] ss:$16 sps:$4 sm:$0xff]  }
 0x5c7   : > { %2194 = vmatpush1.bf16.msra.mxu0 %v5502_v7  ;;  %v3627_v7 = vld [vmem:[#allocation11 + $0x2c] ss:$16 sps:$4 sm:$0xff]  }
 0x5c8   : > { %2195 = vmatprep.subr.bf16.mxu0 %v5503_v1  ;;  %2253 = vmatpush1.bf16.msra.mxu1 %v5504_v4  ;;  %v3625_v1 = vld [vmem:[#allocation11 + $0x28] ss:$16 sps:$4 sm:$0xff]   ;;  %v3633_v4 = vld [vmem:[#allocation11 + $0x4c] ss:$16 sps:$4 sm:$0xff]  }
 0x5c9   : > { %2254 = vmatprep.subr.bf16.mxu1 %v5505_v16  ;;  %v3639_v16 = vld [vmem:[#allocation11 + $0x6c] ss:$16 sps:$4 sm:$0xff]  }
 0x5cb   : > { %2196 = vmatpush1.bf16.msra.mxu0 %v5506_v9  ;;  %v3645_v9 = vld [vmem:[#allocation11 + $0x8c] ss:$16 sps:$4 sm:$0xff]  }
 0x5cc   : > { %2197 = vmatprep.subr.bf16.mxu0 %v5507_v11  ;;  %2255 = vmatpush1.bf16.msra.mxu1 %v5508_v6  ;;  %v3643_v11 = vld [vmem:[#allocation11 + $0x88] ss:$16 sps:$4 sm:$0xff]   ;;  %v3651_v6 = vld [vmem:[#allocation11 + $0xac] ss:$16 sps:$4 sm:$0xff]  }
 0x5cd   : > { %2256 = vmatprep.subr.bf16.mxu1 %v5509_v23  ;;  %v3649_v23 = vld [vmem:[#allocation11 + $0xa8] ss:$16 sps:$4 sm:$0xff]  }
 0x5cf   : > { %2198 = vmatpush1.bf16.msra.mxu0 %v5510_v25  ;;  %v3657_v25 = vld [vmem:[#allocation11 + $0xcc] ss:$16 sps:$4 sm:$0xff]  }
 0x5d0   : > { %2257 = vmatpush1.bf16.msra.mxu1 %v5511_v63  ;;  %2709 = vmatprep.subr.bf16.mxu0 %v3618_v62  ;;  %v3655_v63 = vld [vmem:[#allocation11 + $0xc8] ss:$16 sps:$4 sm:$0xff]  }
 0x5d1   : > { %2750 = vmatprep.subr.bf16.mxu1 %v3621_v50  ;;  %v3661_v62 = vld [vmem:[#allocation11 + $0xe8] ss:$16 sps:$4 sm:$0xff]  }
 0x5d2   : > { %2200 = vmatmul.mubr.bf16.vlgmr.msra.gmra.mrb[24].mxu0 %v4995_v3  ;;  %v3640_v3 = vld [vmem:[#allocation11 + $0x80] ss:$16 sps:$4 sm:$0xff]  }
 0x5d3   : > { %2710 = vmatpush1.bf16.msra.mxu0 %v3616_v2  ;;  %v3663_v2 = vld [vmem:[#allocation11 + $0xec] ss:$16 sps:$4 sm:$0xff]  }
 0x5d4   : > { %2711 = vmatprep.subr.bf16.mxu0 %v3624_v21 }
 0x5d7   : > { %2712 = vmatpush1.bf16.msra.mxu0 %v3622_v8 }
 0x5d8   : > { %2713 = vmatprep.subr.bf16.mxu0 %v3630_v5 }
 0x5db   : > { %2714 = vmatpush1.bf16.msra.mxu0 %v3628_v10 }
 0x5dc   : > { %2715 = vmatprep.subr.bf16.mxu0 %v3636_v46 }
 0x5df   : > { %2716 = vmatpush1.bf16.msra.mxu0 %v3634_v27  ;;  %v3666_v27 = vld [vmem:[#allocation11 + $0x104] ss:$16 sps:$4 sm:$0xff]  }
 0x5e0   : > { %2717 = vmatprep.subr.bf16.mxu0 %v3642_v32  ;;  %v3669_v32 = vld [vmem:[#allocation11 + $0x10c] ss:$16 sps:$4 sm:$0xff]  }
 0x5e3   : > { %2718 = vmatpush1.bf16.msra.mxu0 %v3640_v3  ;;  %v3664_v3 = vld [vmem:[#allocation11 + $0x100] ss:$16 sps:$4 sm:$0xff]  }
 0x5e4   : > { %2719 = vmatprep.subr.bf16.mxu0 %v3648_v35  ;;  %v3667_v35 = vld [vmem:[#allocation11 + $0x108] ss:$16 sps:$4 sm:$0xff]  }
 0x5e7   : > { %2720 = vmatpush1.bf16.msra.mxu0 %v3646_v36  ;;  %v3672_v36 = vld [vmem:[#allocation11 + $0x124] ss:$16 sps:$4 sm:$0xff]  }
 0x5e8   : > { %2721 = vmatprep.subr.bf16.mxu0 %v3654_v39  ;;  %v3675_v39 = vld [vmem:[#allocation11 + $0x12c] ss:$16 sps:$4 sm:$0xff]  }
 0x5eb   : > { %2722 = vmatpush1.bf16.msra.mxu0 %v3652_v40  ;;  %v3670_v40 = vld [vmem:[#allocation11 + $0x120] ss:$16 sps:$4 sm:$0xff]  }
 0x5ec   : > { %2723 = vmatprep.subr.bf16.mxu0 %v3660_v56  ;;  %v3673_v56 = vld [vmem:[#allocation11 + $0x128] ss:$16 sps:$4 sm:$0xff]  }
 0x5ef   : > { %2724 = vmatpush1.bf16.msra.mxu0 %v3658_v60  ;;  %v3676_v60 = vld [vmem:[#allocation11 + $0x140] ss:$16 sps:$4 sm:$0xff]  }
 0x5f0   : > { %2725 = vmatprep.subr.bf16.mxu0 %v3666_v27 }
 0x5f3   : > { %2726 = vmatpush1.bf16.msra.mxu0 %v3664_v3 }
 0x5f4   : > { %2727 = vmatprep.subr.bf16.mxu0 %v3672_v36 }
 0x5f7   : > { %2728 = vmatpush1.bf16.msra.mxu0 %v3670_v40 }
 0x665   : > { %v2119_v43 = vpop.f32.mrb[20].mxu0  ;;  %v2160_v44 = vpop.f32.mrb[20].mxu1 }
 0x666   : > { %v2208_v14 = vrot.slane %v2160_v44, 7  ;;  %v2210_v18 = vrot.slane %v2160_v44, 1  ;;  %v2121_v47 = vpop.f32.mrb[21].mxu0  ;;  %v2162_v49 = vpop.f32.mrb[21].mxu1  ;;  %v3684_v44 = vld [vmem:[#allocation11 + $0x164] ss:$16 sps:$4 sm:$0xff]  }
 0x667   : > { %v2209_v24 = vrot.slane %v2162_v49, 7  ;;  %v2211_v28 = vrot.slane %v2162_v49, 1  ;;  %v2123_v29 = vpop.f32.mrb[22].mxu0  ;;  %v2164_v30 = vpop.f32.mrb[22].mxu1  ;;  %v3690_v49 = vld [vmem:[#allocation11 + $0x184] ss:$16 sps:$4 sm:$0xff]  }
 0x668   : > { %v2212_v33 = vadd.f32 %v2208_v14, %v2119_v43  ;;  %v2218_v34 = vadd.f32 %v2210_v18, %v2119_v43  ;;  %v2124_v37 = vpop.f32.mrb[23].mxu0  ;;  %v2165_v38 = vpop.f32.mrb[23].mxu1  ;;  %v3679_v43 = vld [vmem:[#allocation11 + $0x148] ss:$16 sps:$4 sm:$0xff]   ;;  %v3687_v14 = vld [vmem:[#allocation11 + $0x16c] ss:$16 sps:$4 sm:$0xff]  }
 0x669   : > { %v2213_v42 = vadd.f32 %v2209_v24, %v2121_v47  ;;  %v2219_v45 = vadd.f32 %v2211_v28, %v2121_v47  ;;  %v3682_v18 = vld [vmem:[#allocation11 + $0x160] ss:$16 sps:$4 sm:$0xff]   ;;  %v3685_v47 = vld [vmem:[#allocation11 + $0x168] ss:$16 sps:$4 sm:$0xff]   ;;  %v3693_v24 = vld [vmem:[#allocation11 + $0x18c] ss:$16 sps:$4 sm:$0xff]  }
 0x66a   : > { %v2214_v53 = vadd.f32 %v2212_v33, %v4791_v19  ;;  %v2220_v55 = vadd.f32 %v2218_v34, %v4791_v19  ;;  %v3631_v19 = vld [vmem:[#allocation11 + $0x48] ss:$16 sps:$4 sm:$0xff]   ;;  %v3688_v28 = vld [vmem:[#allocation11 + $0x180] ss:$16 sps:$4 sm:$0xff]   ;;  %v3696_v33 = vld [vmem:[#allocation11 + $0x1a4] ss:$16 sps:$4 sm:$0xff]  }
 0x66b   : > { %v2215_v12 = vadd.f32 %v2213_v42, %v4797_v20  ;;  %v2221_v13 = vadd.f32 %v2219_v45, %v4797_v20  ;;  %v3637_v20 = vld [vmem:[#allocation11 + $0x68] ss:$16 sps:$4 sm:$0xff]   ;;  %v3694_v30 = vld [vmem:[#allocation11 + $0x1a0] ss:$16 sps:$4 sm:$0xff]   ;;  %v3699_v37 = vld [vmem:[#allocation11 + $0x1ac] ss:$16 sps:$4 sm:$0xff]  }
 0x66c   : > { %v2216_v17 = vmax.f32 %v2214_v53, 0.0  ;;  %v2222_v22 = vmax.f32 %v2220_v55, 0.0  ;;  %v3691_v29 = vld [vmem:[#allocation11 + $0x188] ss:$16 sps:$4 sm:$0xff]   ;;  %v3702_v38 = vld [vmem:[#allocation11 + $0x1c4] ss:$16 sps:$4 sm:$0xff]  }
 0x66d   : > { %v2217_v48 = vmax.f32 %v2215_v12, 0.0  ;;  %v2223_v57 = vmax.f32 %v2221_v13, 0.0  ;;  %v3697_v34 = vld [vmem:[#allocation11 + $0x1a8] ss:$16 sps:$4 sm:$0xff]   ;;  %v3705_v42 = vld [vmem:[#allocation11 + $0x1cc] ss:$16 sps:$4 sm:$0xff]  }
 0x66e   : > { %v2224_v59 = vpack.c.bf16 %v2222_v22, %v2216_v17  ;;  %v3700_v45 = vld [vmem:[#allocation11 + $0x1c0] ss:$16 sps:$4 sm:$0xff]   ;;  %v3703_v53 = vld [vmem:[#allocation11 + $0x1c8] ss:$16 sps:$4 sm:$0xff]   ;;  %v3708_v55 = vld [vmem:[#allocation11 + $0x1e4] ss:$16 sps:$4 sm:$0xff]  }
 0x66f   : > { %v2225_v61 = vpack.c.bf16 %v2223_v57, %v2217_v48  ;;  %v3711_v12 = vld [vmem:[#allocation11 + $0x1ec] ss:$16 sps:$4 sm:$0xff]   ;;  %v3706_v13 = vld [vmem:[#allocation11 + $0x1e0] ss:$16 sps:$4 sm:$0xff]   ;;  %v3709_v17 = vld [vmem:[#allocation11 + $0x1e8] ss:$16 sps:$4 sm:$0xff]  }
 0x671   : > { %2258 = vmatprep.mubr.bf16.mxu1 %v2225_v61 }
 0x672   : > { %2259 = vmatmul.mubr.bf16.vlgmr.msra.gmra.mrb[24].mxu1 %v2224_v59 }
 0x673   : > { %2751 = vmatpush1.bf16.msra.mxu1 %v3619_v58 }
 0x674   : > { %2752 = vmatprep.subr.bf16.mxu1 %v3627_v7 }
 0x677   : > { %2753 = vmatpush1.bf16.msra.mxu1 %v3625_v1 }
 0x678   : > { %2754 = vmatprep.subr.bf16.mxu1 %v3633_v4 }
 0x67b   : > { %2755 = vmatpush1.bf16.msra.mxu1 %v3631_v19 }
 0x67c   : > { %2756 = vmatprep.subr.bf16.mxu1 %v3639_v16 }
 0x67f   : > { %2757 = vmatpush1.bf16.msra.mxu1 %v3637_v20 }
 0x680   : > { %2758 = vmatprep.subr.bf16.mxu1 %v3645_v9 }
 0x683   : > { %2759 = vmatpush1.bf16.msra.mxu1 %v3643_v11 }
 0x684   : > { %2760 = vmatprep.subr.bf16.mxu1 %v3651_v6 }
 0x687   : > { %2761 = vmatpush1.bf16.msra.mxu1 %v3649_v23 }
 0x688   : > { %2762 = vmatprep.subr.bf16.mxu1 %v3657_v25 }
 0x68b   : > { %2763 = vmatpush1.bf16.msra.mxu1 %v3655_v63 }
 0x68c   : > { %2764 = vmatprep.subr.bf16.mxu1 %v3663_v2 }
 0x68f   : > { %2765 = vmatpush1.bf16.msra.mxu1 %v3661_v62 }
 0x690   : > { %2766 = vmatprep.subr.bf16.mxu1 %v3669_v32 }
 0x693   : > { %2767 = vmatpush1.bf16.msra.mxu1 %v3667_v35 }
 0x694   : > { %2768 = vmatprep.subr.bf16.mxu1 %v3675_v39 }
 0x697   : > { %2769 = vmatpush1.bf16.msra.mxu1 %v3673_v56 }
 0x6a5   : > { %v2201_v50 = vpop.f32.mrb[24].mxu0 }
 0x6a6   : > { %v5056_v21 = vadd.f32 %v2201_v50, %v5461_v52  ;;  %v2203_v8 = vpop.f32.mrb[25].mxu0  ;;  %v3678_v52 = vld [vmem:[#allocation11 + $0x144] ss:$16 sps:$4 sm:$0xff]  }
 0x6a7   : > { %v5059_v5 = vadd.f32 %v2203_v8, %v5462_v0  ;;  %v2205_v10 = vpop.f32.mrb[26].mxu0  ;;  %v3681_v0 = vld [vmem:[#allocation11 + $0x14c] ss:$16 sps:$4 sm:$0xff]   ;;  %2729 = vmatprep.subr.bf16.mxu0 %v3678_v52  ;;  %v5512_v52 = vld [vmem:[#allocation25_spill] sm:$0xff] }
 0x6a8   : > { %v2206_v46 = vpop.f32.mrb[27].mxu0  ;;  %2770 = vmatprep.subr.bf16.mxu1 %v3681_v0  ;;  %2730 = vmatpush1.bf16.msra.mxu0 %v3676_v60  ;;  %v2281_v25 = vadd.f32 %v5056_v21, %v4861_v54  ;;  %v2699_v0 = vsub.s32 2, %v5512_v52  ;;  %v488_v60 = vld [vmem:[%s5513_s5] sm:$0xf] }
 0x6a9   : > { %2771 = vmatpush1.bf16.msra.mxu1 %v3679_v43  ;;  %2731 = vmatprep.subr.bf16.mxu0 %v3684_v44  ;;  %v2703_v43 = vsub.s32 3, %v5512_v52  ;;  %v5514_v44 = vld [vmem:[#allocation26_spill] sm:$0xff] }
 0x6aa   : > { %2772 = vmatprep.subr.bf16.mxu1 %v3687_v14  ;;  %v2692_v14 = vrot.slane %v488_v60, %v5514_v44 }
 0x6ac   : > { %2732 = vmatpush1.bf16.msra.mxu0 %v3682_v18  ;;  %v2700_v18 = vrot.slane %v488_v60, %v2699_v0 }
 0x6ad   : > { %2773 = vmatpush1.bf16.msra.mxu1 %v3685_v47  ;;  %2733 = vmatprep.subr.bf16.mxu0 %v3690_v49  ;;  %v5515_v47 = vld [vmem:[#allocation27_spill] sm:$0xff] }
 0x6ae   : > { %2774 = vmatprep.subr.bf16.mxu1 %v3693_v24  ;;  %v2696_v49 = vrot.slane %v488_v60, %v5515_v47  ;;  %v2704_v24 = vrot.slane %v488_v60, %v2703_v43 }
 0x6b0   : > { %2734 = vmatpush1.bf16.msra.mxu0 %v3688_v28 }
 0x6b1   : > { %2775 = vmatpush1.bf16.msra.mxu1 %v3691_v29  ;;  %2735 = vmatprep.subr.bf16.mxu0 %v3696_v33 }
 0x6b2   : > { %2776 = vmatprep.subr.bf16.mxu1 %v3699_v37 }
 0x6b4   : > { %2736 = vmatpush1.bf16.msra.mxu0 %v3694_v30 }
 0x6b5   : > { %2777 = vmatpush1.bf16.msra.mxu1 %v3697_v34  ;;  %2737 = vmatprep.subr.bf16.mxu0 %v3702_v38 }
 0x6b6   : > { %2778 = vmatprep.subr.bf16.mxu1 %v3705_v42 }
 0x6b8   : > { %2738 = vmatpush1.bf16.msra.mxu0 %v3700_v45 }
 0x6b9   : > { %2779 = vmatpush1.bf16.msra.mxu1 %v3703_v53  ;;  %2739 = vmatprep.subr.bf16.mxu0 %v3708_v55 }
 0x6ba   : > { %2780 = vmatprep.subr.bf16.mxu1 %v3711_v12 }
 0x6bc   : > { %2740 = vmatpush1.bf16.msra.mxu0 %v3706_v13 }
 0x6bd   : > { %2781 = vmatpush1.bf16.msra.mxu1 %v3709_v17 }
 0x745   : > { %v2260_v22 = vpop.f32.mrb[24].mxu1 }
 0x746   : > { %v2261_v48 = vadd.f32 %v2260_v22, %v5469_v41  ;;  %v2262_v57 = vpop.f32.mrb[25].mxu1 }
 0x747   : > { %v2263_v59 = vadd.f32 %v2262_v57, %v5470_v51  ;;  %v2264_v61 = vpop.f32.mrb[26].mxu1 }
 0x748   : > { %v2269_v58 = vmax.f32 %v2261_v48, 0.0  ;;  %v2265_v7 = vadd.f32 %v2264_v61, %v5469_v41  ;;  %v2266_v1 = vpop.f32.mrb[27].mxu1  ;;  %v2282_v41 = vadd.f32 %v5059_v5, %v4864_v26 }
 0x749   : > { %v2270_v4 = vmax.f32 %v2263_v59, 0.0  ;;  %v2267_v19 = vadd.f32 %v2266_v1, %v5470_v51 }
 0x74a   : > { %v2271_v16 = vmax.f32 %v2265_v7, 0.0  ;;  %v2273_v9 = vmul.f32 %v4855_v31, %v2269_v58 }
 0x74b   : > { %v2272_v20 = vmax.f32 %v2267_v19, 0.0  ;;  %v2274_v6 = vmul.f32 %v4855_v31, %v2270_v4 }
 0x74c   : > { %v2275_v11 = vmul.f32 %v4857_v15, %v2271_v16 }
 0x74d   : > { %v2276_v23 = vmul.f32 %v4857_v15, %v2272_v20 }
 0x74e   : > { %v2277_v63 = vadd.f32 %v2275_v11, %v2273_v9 }
 0x74f   : > { %v2278_v2 = vadd.f32 %v2276_v23, %v2274_v6 }
 0x750   : > { %v2283_v62 = vadd.f32 %v2281_v25, %v2277_v63 }
 0x751   : > { %v2284_v51 = vadd.f32 %v2282_v41, %v2278_v2 }
 0x752   : > { %v2285_v50 = vmax.f32 %v2283_v62, 0.0 }
 0x753   : > { %v2286_v8 = vmax.f32 %v2284_v51, 0.0 }
 0x754   : > { %v2287_v10 = vrot.slane %v2285_v50, 4 }
 0x755   : > { %v2293_v46 = vrot.slane %v2286_v8, 4 }
 0x756   : > { %v2288_v27 = vadd.f32 %v2287_v10, %v2285_v50 }
 0x757   : > { %v2294_v32 = vadd.f32 %v2293_v46, %v2286_v8 }
 0x758   : > { %v2289_v3 = vrot.slane %v2288_v27, 2 }
 0x759   : > { %v2295_v31 = vrot.slane %v2294_v32, 2 }
 0x75a   : > { %v2290_v35 = vadd.f32 %v2289_v3, %v2288_v27 }
 0x75b   : > { %v2296_v15 = vadd.f32 %v2295_v31, %v2294_v32 }
 0x75c   : > { %v2291_v36 = vrot.slane %v2290_v35, 1 }
 0x75d   : > { %v2297_v39 = vrot.slane %v2296_v15, 1 }
 0x75e   : > { %v2292_v54 = vadd.f32 %v2291_v36, %v2290_v35 }
 0x75f   : > { %v2298_v21 = vadd.f32 %v2297_v39, %v2296_v15 }
 0x760   : > { %v2300_v40 = vmul.f32 0.125, %v2292_v54 }
 0x761   : > { %v2301_v56 = vmul.f32 0.125, %v2298_v21 }
 0x762   : > { %v2302_v5 = vpack.c.bf16 %v2300_v40, %v2300_v40 }
 0x763   : > { %v2303_v26 = vpack.c.bf16 %v2301_v56, %v2301_v56 }
 0x765   : > { %2741 = vmatprep.mubr.bf16.mxu0 %v2303_v26  ;;  %2782 = vmatprep.mubr.bf16.mxu1 %v2303_v26 }
 0x766   : > { %2742 = vmatmul.mubr.bf16.vlgmr.msra.gmra.mrb[28].mxu0 %v2302_v5  ;;  %2783 = vmatmul.mubr.bf16.vlgmr.msra.gmra.mrb[28].mxu1 %v2302_v5 }
 0x839   : > { %v2743_v28 = vpop.f32.mrb[28].mxu0  ;;  %v2784_v29 = vpop.f32.mrb[28].mxu1 }
 0x83a   : > { %v2744_v30 = vadd.f32 %v2743_v28, %v2692_v14  ;;  %v2785_v33 = vadd.f32 %v2784_v29, %v2700_v18  ;;  %v2745_v34 = vpop.f32.mrb[29].mxu0  ;;  %v2786_v37 = vpop.f32.mrb[29].mxu1 }
 0x83b   : > { %v2746_v38 = vadd.f32 %v2745_v34, %v2696_v49  ;;  %v2787_v42 = vadd.f32 %v2786_v37, %v2704_v24  ;;  %v2747_v45 = vpop.f32.mrb[30].mxu0  ;;  %v2788_v53 = vpop.f32.mrb[30].mxu1 }
 0x83c   : > { %v2792_v55 = vsel %vm2791_vm2, %v2744_v30, -inf  ;;  %v2794_v12 = vsel %vm2791_vm2, %v2785_v33, -inf  ;;  %v2748_v13 = vpop.f32.mrb[31].mxu0  ;;  %v2789_v17 = vpop.f32.mrb[31].mxu1 }
 0x83d   : > { %v2793_v22 = vsel %vm2791_vm2, %v2746_v38, -inf  ;;  %v2795_v48 = vsel %vm2791_vm2, %v2787_v42, -inf }
 0x83e   : > { %v2796_v57 = vmax.f32 %v2792_v55, %v2793_v22  ;;  %v2797_v59 = vmax.f32 %v2794_v12, %v2795_v48 }
 0x840   : > { %v2798_v61 = vmax.f32 %v2796_v57, %v2797_v59 }
 0x842   : > { %2799 = vmax.xlane.f32.xlu0 %v2798_v61 }
 0x8cf   : > { %v2800_v58 = vpop.xlane.xlu0 %2799 }
 0x8d0   : > { %v2801_v7 = vsub.f32 %v2744_v30, %v2800_v58  ;;  %v2802_v1 = vsub.f32 %v2746_v38, %v2800_v58  ;;  %v2803_v4 = vsub.f32 %v2785_v33, %v2800_v58  ;;  %v2804_v19 = vsub.f32 %v2787_v42, %v2800_v58 }
 0x8d2   : > { %v2805_v16 = vmul.f32 1.442695, %v2801_v7  ;;  %v2807_v20 = vmul.f32 1.442695, %v2802_v1  ;;  %v2809_v9 = vmul.f32 1.442695, %v2803_v4 }
 0x8d3   : > { %v2811_v11 = vmul.f32 1.442695, %v2804_v19 }
 0x8d4   : > { %3712 = vpow2.f32 %v2805_v16 }
 0x8d5   : > { %3714 = vpow2.f32 %v2807_v20 }
 0x8d6   : > { %3716 = vpow2.f32 %v2809_v9 }
 0x8d7   : > { %3718 = vpow2.f32 %v2811_v11 }
 0x8de   : > { %v3713_v6 = vpop.eup %3712 }
 0x8df   : > { %v3715_v23 = vpop.eup %3714  ;;  %v2813_v25 = vsel %vm2791_vm2, %v3713_v6, 0.0 }
 0x8e0   : > { %v3717_v63 = vpop.eup %3716  ;;  %v2814_v41 = vsel %vm2791_vm2, %v3715_v23, 0.0 }
 0x8e1   : > { %v3719_v2 = vpop.eup %3718  ;;  %v2815_v62 = vadd.f32 %v2814_v41, %v2813_v25  ;;  %v2816_v51 = vsel %vm2791_vm2, %v3717_v63, 0.0 }
 0x8e2   : > { %v2818_v8 = vsel %vm2791_vm2, %v3719_v2, 0.0 }
 0x8e3   : > { %v2817_v50 = vadd.f32 %v2816_v51, %v2815_v62 }
 0x8e5   : > { %v2819_v10 = vadd.f32 %v2818_v8, %v2817_v50 }
 0x8e7   : > { %2820 = vadd.xlane.f32.xlu0 %v2819_v10 }
 0x974   : > { %v2821_v46 = vpop.xlane.xlu0 %2820 }
 0x975   : > { %3720 = vlog2.f32 %v2821_v46 }
 0x97f   : > { %v3721_v27 = vpop.eup %3720 }
 0x980   : > { %v2823_v32 = vmul.f32 0.6931472, %v3721_v27 }
 0x982   : > { %v2824_v3 = vsub.f32 %v2801_v7, %v2823_v32  ;;  %v2825_v31 = vsub.f32 %v2802_v1, %v2823_v32  ;;  %v2826_v35 = vsub.f32 %v2803_v4, %v2823_v32  ;;  %v2827_v15 = vsub.f32 %v2804_v19, %v2823_v32 }
 0x984   : > { %v2831_v36 = vrot.slane %v2824_v3, %v5514_v44  ;;  %v2835_v39 = vrot.slane %v2825_v31, %v5514_v44  ;;  %v2839_v54 = vrot.slane %v2826_v35, %v5514_v44  ;;  %v2843_v21 = vrot.slane %v2827_v15, %v5514_v44 }
 0x986   : > { %2844 = vst [vmem:[%s474_s24] sm:$0xff] %v2831_v36  ;;  %2845 = vst [vmem:[%s474_s24 + $0x8] sm:$0xff] %v2835_v39 }
 0x987   : > { %2846 = vst [vmem:[%s474_s24 + $0x10] sm:$0xff] %v2839_v54  ;;  %2847 = vst [vmem:[%s474_s24 + $0x18] sm:$0xff] %v2843_v21 }
 0x988   : > { %3944 = shalt.err (!%p3941_p3)
}
 0x989   : > { %s3945_s30 = scalar_lea.hbm %s5097_s23, 512  ;;  %s3949_s11 = scalar_lea.hbm %s5516_s26, 1024 }
 0x98a   : > { %p3946_p6 = scmp.ne.s32.totalorder %s5097_s23, %s3945_s30  ;;  %p3950_p8 = scmp.lt.u32.totalorder %s5097_s23, %s5516_s26 }
 0x98b   : > { %p3951_p5 = scmp.lt.u32.totalorder %s3949_s11, %s3945_s30  ;;  %p3953_p7 = scmp.lt.u32.totalorder %s3945_s30, %s5097_s23 }
 0x98c   : > { %p3947_p10 = pnand %p3946_p6, %p5517_p4 }
 0x98d   : > { %p3952_p9 = por %p3951_p5, %p3950_p8 }
 0x98e   : > { %p3948_p11 = pneg %p3947_p10 }
 0x98f   : > { %p3954_p12 = por %p3953_p7, %p3952_p9 }
 0x991   : > { %p3955_p1 = pnand %p3954_p12, %p3948_p11 }
 0x993   : > { %3958 = shalt.err (!%p3955_p1)
}
 0x994   : > { %3269 = dma.vmem_to_hbm [thread:$0]  (%p5517_p4), %s5099_s27, 512, %s5097_s23, %s2849_s29  }
 0x995 PF: > { %s2875_s28 = sand.u32 1, %s3997_s17   ;;  %p5518_p13 = scmp.ne.s32.totalorder %s5307_s10, 0 }
 0x996   : > { %p5519_p0 = scmp.ge.s32.totalorder %s4009_s20, 2  ;;  %s2876_s16 = scalar_lea.sflag [#allocation4], %s2875_s28 }
 0x998   : > { %p3292_p2 = pnand %p5519_p0, %p5518_p13 }
 0x99a   : > { %3992 = dma.done.wait (!%p3292_p2), %s2876_s16, 512  }
 0x99b   : > { %3994 = vsyncadd (!%p3292_p2), %s2876_s16, 4294966784  ;;  %p27_p3 = scmp.ge.s32.totalorder %s4253_s12, 4   ;;  %s5520_s17 = smov %s4001_s18 }
 0x99c   : > { %s5521_s18 = smov %s4005_s19  ;;  %s5522_s19 = smov %s4265_s22 }
 0x99d   : > { %s5523_s20 = smov %s4253_s12  ;;  %29 = sbr.rel (!%p27_p3) target bundleno = 14 (0xe), region = 129 }
 0x9a4   :  { %2881 = vsyncpa [#allocation3], 1 }
 0x9a5   :  { %2883 = vsyncpa [#allocation3 + $0x1], 1 }
 0x9a6   :  { %2884 = vsyncpa [#allocation6], 1 }
 0x9a7   :  { %2885 = vsyncpa [#allocation9], 1 }
 0x9a8   :  { %2886 = vsyncpa [#allocation12], 1 }
 0x9a9   :  { %2887 = vsyncpa [#allocation4], 1 }
 0x9aa   :  { %2889 = vsyncpa [#allocation4 + $0x1], 1 }

</bundles_post_ra>
